<compile_context>
chip_gen: v5e
topology: v5e:2x2
jax: 0.10.0
libtpu: 0.0.40
codegen_flags: <defaults>
</compile_context>

<pallas_src>
import functools
import math

import jax
import jax.numpy as jnp
from jax.experimental import pallas as pl
from jax.experimental.pallas import tpu as pltpu


# ----------------------------- kernel ---------------------------------------

def _layer_norm(x, gamma, beta, eps=1e-5):
    mu = jnp.mean(x, axis=-1, keepdims=True)
    var = jnp.mean((x - mu) ** 2, axis=-1, keepdims=True)
    return (x - mu) * jax.lax.rsqrt(var + eps) * gamma + beta


def encoder_kernel(x_ref, mask_ref,
                   wqkv_ref, bqkv_ref, wo_ref, bo_ref,
                   w1_ref, b1_ref, w2_ref, b2_ref,
                   g1_ref, be1_ref, g2_ref, be2_ref,
                   o_ref, *, n_heads):
    """grid = (batch, layer).  One grid step = one encoder layer applied to one
    batch element's (S, D) slab.  The residual stream lives in o_ref (constant
    output block index across the inner layer axis -> resident in VMEM, written
    back to HBM once after the last layer of that batch element)."""
    layer = pl.program_id(1)

    # Initialize the resident activation slab from the (aliased) input at layer 0.
    @pl.when(layer == 0)
    def _():
        o_ref[...] = x_ref[...]

    x = o_ref[...]                                   # (S, D) f32 residual stream
    S, D = x.shape
    H = n_heads
    Dh = D // H
    scale = 1.0 / math.sqrt(Dh)
    cdt = wqkv_ref.dtype                             # matmul operand dtype (f32 or bf16)

    # ---------------- self attention ----------------------------------------
    # Packed in-projection: one (S, D) x (D, 3D) MXU matmul, f32 accumulation.
    qkv = jnp.dot(x.astype(cdt), wqkv_ref[...],
                  preferred_element_type=jnp.float32) + bqkv_ref[...]   # (S, 3D) f32

    # One head-major relayout per step (leading head axis), then everything is
    # batched over heads — no per-head lane slicing inside a loop.
    q = jnp.transpose((qkv[:, 0 * D:1 * D] * scale).reshape(S, H, Dh), (1, 0, 2))
    k = jnp.transpose(qkv[:, 1 * D:2 * D].reshape(S, H, Dh), (1, 0, 2))
    v = jnp.transpose(qkv[:, 2 * D:3 * D].reshape(S, H, Dh), (1, 0, 2))   # (H, S, Dh)

    # Scores: batched dot_general contracting the last dims (no explicit k.T).
    s = jnp.einsum('hqd,hkd->hqk', q.astype(cdt), k.astype(cdt),
                   preferred_element_type=jnp.float32)                    # (H, S, S)
    s = s + mask_ref[...][None]            # single (1,1,S) key-mask broadcast per step

    # Softmax with deferred normalization (mask/max/exp/sum kept in f32).
    s = s - jnp.max(s, axis=-1, keepdims=True)
    p = jnp.exp(s)                                                        # unnormalized
    inv = pl.reciprocal(jnp.sum(p, axis=-1, keepdims=True), approx=False)  # (H, S, 1)

    o_h = jnp.einsum('hqk,hkd->hqd', p.astype(cdt), v.astype(cdt),
                     preferred_element_type=jnp.float32) * inv            # (H, S, Dh)

    # Merge heads back onto the lane dim, then ONE fused K=D output projection.
    attn = jnp.transpose(o_h, (1, 0, 2)).reshape(S, D)
    attn = jnp.dot(attn.astype(cdt), wo_ref[...],
                   preferred_element_type=jnp.float32) + bo_ref[...]

    # residual + norm1 (f32)
    x = _layer_norm(x + attn, g1_ref[...], be1_ref[...])

    # ---------------- feed-forward (exact erf GELU, as F.gelu default) -------
    h = jnp.dot(x.astype(cdt), w1_ref[...],
                preferred_element_type=jnp.float32) + b1_ref[...]
    h = 0.5 * h * (1.0 + jax.lax.erf(h * (1.0 / math.sqrt(2.0))))
    h = jnp.dot(h.astype(cdt), w2_ref[...],
                preferred_element_type=jnp.float32) + b2_ref[...]

    # residual + norm2 -> write back to the resident slab
    o_ref[...] = _layer_norm(x + h, g2_ref[...], be2_ref[...])


# ----------------------------- wrapper ---------------------------------------

@functools.partial(jax.jit, static_argnames=("n_heads", "compute_dtype"))
def encoder_forward(x, e_mask, params, n_heads, compute_dtype=jnp.float32):
    """x: (B, S, D) f32, e_mask: (B, S) bool (True = padding position).
    params: dict of per-layer weights stacked along a leading L dim.
    compute_dtype: dtype of the matmul operands (weights streamed in this dtype;
    accumulation, softmax, LayerNorm, residuals stay f32)."""
    B, S, D = x.shape
    L = params['wqkv'].shape[0]
    PFF = params['w1'].shape[-1]

    # Additive key-padding mask (0 keep, -1e30 pad), kept f32.
    add_mask = jnp.where(e_mask, -1e30, 0.0).astype(jnp.float32).reshape(B, 1, S)
    x2 = x.reshape(B * S, D).astype(jnp.float32)

    cast = lambda w: w.astype(compute_dtype)   # weight matrices only (biases/norms f32)

    def wspec(shape):
        # One layer's slice of a stacked parameter; leading L dim squeezed.
        return pl.BlockSpec((None,) + shape, lambda b, l: (l,) + (0,) * len(shape))

    kernel = functools.partial(encoder_kernel, n_heads=n_heads)
    out = pl.pallas_call(
        kernel,
        out_shape=jax.ShapeDtypeStruct((B * S, D), jnp.float32),
        grid=(B, L),                                          # (parallel, arbitrary)
        in_specs=[
            pl.BlockSpec((S, D), lambda b, l: (b, 0)),        # per-batch activation tile
            pl.BlockSpec((None, 1, S), lambda b, l: (b, 0, 0)),  # additive key mask
            wspec((D, 3 * D)), wspec((1, 3 * D)),             # in_proj
            wspec((D, D)), wspec((1, D)),                     # out_proj
            wspec((D, PFF)), wspec((1, PFF)),                 # linear1
            wspec((PFF, D)), wspec((1, D)),                   # linear2
            wspec((1, D)), wspec((1, D)),                     # norm1 gamma/beta
            wspec((1, D)), wspec((1, D)),                     # norm2 gamma/beta
        ],
        out_specs=pl.BlockSpec((S, D), lambda b, l: (b, 0)),  # resident across layers
        input_output_aliases={0: 0},                          # x slab aliases the output
        compiler_params=pltpu.CompilerParams(
            dimension_semantics=("parallel", "arbitrary"),    # batch || layers (v7x 2 TCs)
            vmem_limit_bytes=48 * 1024 * 1024),               # explicit, fits v5e/v6e/v7x
    )(x2, add_mask,
      cast(params['wqkv']), params['bqkv'],
      cast(params['wo']), params['bo'],
      cast(params['w1']), params['b1'],
      cast(params['w2']), params['b2'],
      params['g1'], params['beta1'], params['g2'], params['beta2'])
    return out.reshape(B, S, D)


# ----------------------- deterministic parameter init ------------------------

def init_params(key, n_layers, d_model, n_heads, pff_dim):
    def one(k):
        ks = jax.random.split(k, 10)
        s = 0.05
        return dict(
            # pre-transposed to (in, out)
            wqkv=(jax.random.normal(ks[0], (3 * d_model, d_model)) * s).T,
            bqkv=(jax.random.normal(ks[1], (3 * d_model,)) * s).reshape(1, -1),
            wo=(jax.random.normal(ks[2], (d_model, d_model)) * s).T,
            bo=(jax.random.normal(ks[3], (d_model,)) * s).reshape(1, -1),
            w1=(jax.random.normal(ks[4], (pff_dim, d_model)) * s).T,
            b1=(jax.random.normal(ks[5], (pff_dim,)) * s).reshape(1, -1),
            w2=(jax.random.normal(ks[6], (d_model, pff_dim)) * s).T,
            b2=(jax.random.normal(ks[7], (d_model,)) * s).reshape(1, -1),
            g1=(1.0 + jax.random.normal(ks[8], (d_model,)) * 0.01).reshape(1, -1),
            beta1=jnp.zeros((1, d_model), jnp.float32),
            g2=(1.0 + jax.random.normal(ks[9], (d_model,)) * 0.01).reshape(1, -1),
            beta2=jnp.zeros((1, d_model), jnp.float32),
        )

    keys = jax.random.split(key, n_layers)
    layers = [one(k) for k in keys]
    # stack per-layer params along a leading L dim for the fused kernel
    stacked = jax.tree.map(lambda *xs: jnp.stack(xs, axis=0).astype(jnp.float32),
                           *layers)
    return stacked


# ----------------------------- pure-JAX reference ----------------------------

def ref_encoder_forward(x, e_mask, params, n_heads):
    B, S, D = x.shape
    Dh = D // n_heads
    L = params['wqkv'].shape[0]
    add_mask = jnp.where(e_mask, -1e30, 0.0)[:, None, None, :]   # (B,1,1,S)
    for l in range(L):
        p = jax.tree.map(lambda a: a[l], params)
        qkv = x @ p['wqkv'] + p['bqkv'][0]
        q, k, v = jnp.split(qkv, 3, axis=-1)
        q = q.reshape(B, S, n_heads, Dh)
        k = k.reshape(B, S, n_heads, Dh)
        v = v.reshape(B, S, n_heads, Dh)
        s = jnp.einsum('bqhd,bkhd->bhqk', q, k) / math.sqrt(Dh) + add_mask
        pr = jax.nn.softmax(s, axis=-1)
        attn = jnp.einsum('bhqk,bkhd->bqhd', pr, v).reshape(B, S, D)
        attn = attn @ p['wo'] + p['bo'][0]
        x = _layer_norm(x + attn, p['g1'][0], p['beta1'][0])
        h = x @ p['w1'] + p['b1'][0]
        h = 0.5 * h * (1.0 + jax.lax.erf(h / math.sqrt(2.0)))
        h = h @ p['w2'] + p['b2'][0]
        x = _layer_norm(x + h, p['g2'][0], p['beta2'][0])
    return x


# ----------------------------------- main -------------------------------------

if __name__ == "__main__":
    # config: hidden_dim=32, n_heads=4, pff_dim=64, n_layers=2, dropout ignored (eval)
    B, S, D, H, PFF, L = 2, 8, 32, 4, 64, 2

    key = jax.random.PRNGKey(0)
    kx, kp = jax.random.split(key)
    x = jax.random.normal(kx, (B, S, D), jnp.float32)
    # key-padding mask: True = pad. Pad the last two positions of batch 1.
    # (Fully-padded rows would make softmax degenerate; not exercised here.)
    e_mask = jnp.zeros((B, S), jnp.bool_).at[1, -2:].set(True)

    params = init_params(kp, L, D, H, PFF)
    ref = ref_encoder_forward(x, e_mask, params, H)

    # f32 matmul-operand path: must match the pure-JAX reference to 1e-4.
    out = encoder_forward(x, e_mask, params, n_heads=H, compute_dtype=jnp.float32)
    out = jax.block_until_ready(out)
    assert out.shape == (B, S, D)
    assert bool(jnp.all(jnp.isfinite(out)))
    assert bool(jnp.allclose(out, ref, rtol=1e-4, atol=1e-4)), "f32 mismatch vs reference"

    # bf16 weight/operand path (halved weight DMA + bf16 MXU); f32 accumulation,
    # softmax/LayerNorm/residuals stay f32 -> looser tolerance vs the f32 reference.
    out_bf16 = encoder_forward(x, e_mask, params, n_heads=H, compute_dtype=jnp.bfloat16)
    out_bf16 = jax.block_until_ready(out_bf16)
    assert bool(jnp.all(jnp.isfinite(out_bf16)))
    assert bool(jnp.allclose(out_bf16, ref, rtol=5e-2, atol=5e-2)), "bf16 mismatch vs reference"

    print("KERNEL_OK")
</pallas_src>

<mosaic_0001>
module attributes {stable_mosaic.version = 11 : i64} {
  func.func @encoder_kernel(%arg0: i32, %arg1: i32, %arg2: memref<8x32xf32, #tpu.memory_space<vmem>>, %arg3: memref<1x1x8xf32, #tpu.memory_space<vmem>>, %arg4: memref<1x32x96xf32, #tpu.memory_space<vmem>>, %arg5: memref<1x1x96xf32, #tpu.memory_space<vmem>>, %arg6: memref<1x32x32xf32, #tpu.memory_space<vmem>>, %arg7: memref<1x1x32xf32, #tpu.memory_space<vmem>>, %arg8: memref<1x32x64xf32, #tpu.memory_space<vmem>>, %arg9: memref<1x1x64xf32, #tpu.memory_space<vmem>>, %arg10: memref<1x64x32xf32, #tpu.memory_space<vmem>>, %arg11: memref<1x1x32xf32, #tpu.memory_space<vmem>>, %arg12: memref<1x1x32xf32, #tpu.memory_space<vmem>>, %arg13: memref<1x1x32xf32, #tpu.memory_space<vmem>>, %arg14: memref<1x1x32xf32, #tpu.memory_space<vmem>>, %arg15: memref<1x1x32xf32, #tpu.memory_space<vmem>>, %arg16: memref<8x32xf32, #tpu.memory_space<vmem>>) attributes {dimension_semantics = [#tpu.dimension_semantics<parallel>, #tpu.dimension_semantics<arbitrary>], iteration_bounds = array<i64: 2, 2>, scalar_prefetch = 0 : i64, scratch_operands = 0 : i64, tpu.core_type = #tpu.core_type<tc>, window_params = [{transform_indices = @transform_0, window_bounds = array<i64: 8, 32>}, {transform_indices = @transform_1, window_bounds = array<i64: 1, 1, 8>}, {transform_indices = @transform_2, window_bounds = array<i64: 1, 32, 96>}, {transform_indices = @transform_3, window_bounds = array<i64: 1, 1, 96>}, {transform_indices = @transform_4, window_bounds = array<i64: 1, 32, 32>}, {transform_indices = @transform_5, window_bounds = array<i64: 1, 1, 32>}, {transform_indices = @transform_6, window_bounds = array<i64: 1, 32, 64>}, {transform_indices = @transform_7, window_bounds = array<i64: 1, 1, 64>}, {transform_indices = @transform_8, window_bounds = array<i64: 1, 64, 32>}, {transform_indices = @transform_9, window_bounds = array<i64: 1, 1, 32>}, {transform_indices = @transform_10, window_bounds = array<i64: 1, 1, 32>}, {transform_indices = @transform_11, window_bounds = array<i64: 1, 1, 32>}, {transform_indices = @transform_12, window_bounds = array<i64: 1, 1, 32>}, {transform_indices = @transform_13, window_bounds = array<i64: 1, 1, 32>}, {transform_indices = @transform_14, window_bounds = array<i64: 8, 32>}]} {
    %c0_i32 = arith.constant 0 : i32
    %0 = arith.cmpi eq, %arg1, %c0_i32 : i32
    %1 = arith.extui %0 : i1 to i32
    %c0_i32_0 = arith.constant 0 : i32
    %2 = arith.cmpi ne, %1, %c0_i32_0 : i32
    scf.if %2 {
      %c0_64 = arith.constant 0 : index
      %c0_65 = arith.constant 0 : index
      %125 = vector.load %arg2[%c0_64, %c0_65] : memref<8x32xf32, #tpu.memory_space<vmem>>, vector<8x32xf32>
      %c0_66 = arith.constant 0 : index
      %c0_67 = arith.constant 0 : index
      %126 = vector.load %arg16[%c0_66, %c0_67] : memref<8x32xf32, #tpu.memory_space<vmem>>, vector<8x32xf32>
      tpu.vector_store %arg16[%c0_66, %c0_67], %125 {strides = array<i32>} : memref<8x32xf32, #tpu.memory_space<vmem>>, vector<8x32xf32>,
    } else {
    }
    %c0 = arith.constant 0 : index
    %c0_1 = arith.constant 0 : index
    %3 = vector.load %arg16[%c0, %c0_1] : memref<8x32xf32, #tpu.memory_space<vmem>>, vector<8x32xf32>
    %c0_2 = arith.constant 0 : index
    %c0_3 = arith.constant 0 : index
    %c0_4 = arith.constant 0 : index
    %4 = vector.load %arg4[%c0_2, %c0_3, %c0_4] : memref<1x32x96xf32, #tpu.memory_space<vmem>>, vector<1x32x96xf32>
    %5 = vector.shape_cast %4 : vector<1x32x96xf32> to vector<32x96xf32>
    %cst = arith.constant dense<0.000000e+00> : vector<8x96xf32>
    %6 = tpu.matmul %3, %5, %cst {dimension_numbers = #tpu.dot_dimension_numbers<[1], [0], [0], [1], [0, 0, 1, 1], [], []>} : vector<8x32xf32>, vector<32x96xf32>, vector<8x96xf32> -> vector<8x96xf32>
    %c0_5 = arith.constant 0 : index
    %c0_6 = arith.constant 0 : index
    %c0_7 = arith.constant 0 : index
    %7 = vector.load %arg5[%c0_5, %c0_6, %c0_7] : memref<1x1x96xf32, #tpu.memory_space<vmem>>, vector<1x1x96xf32>
    %8 = vector.shape_cast %7 : vector<1x1x96xf32> to vector<1x96xf32>
    %9 = vector.broadcast %8 : vector<1x96xf32> to vector<8x96xf32>
    %10 = arith.addf %6, %9 : vector<8x96xf32>
    %11 = vector.extract_strided_slice %10 {offsets = [0, 0], sizes = [8, 32], strides = [1, 1]} : vector<8x96xf32> to vector<8x32xf32>
    %cst_8 = arith.constant 0.353553385 : f32
    %12 = vector.broadcast %cst_8 : f32 to vector<8x32xf32>
    %13 = arith.mulf %11, %12 : vector<8x32xf32>
    %14 = vector.shape_cast %13 : vector<8x32xf32> to vector<8x4x8xf32>
    %15 = tpu.transpose %14, [1, 0, 2] : vector<8x4x8xf32> -> vector<4x8x8xf32>
    %16 = vector.extract_strided_slice %10 {offsets = [0, 32], sizes = [8, 32], strides = [1, 1]} : vector<8x96xf32> to vector<8x32xf32>
    %17 = vector.shape_cast %16 : vector<8x32xf32> to vector<8x4x8xf32>
    %18 = tpu.transpose %17, [1, 0, 2] : vector<8x4x8xf32> -> vector<4x8x8xf32>
    %19 = vector.extract_strided_slice %10 {offsets = [0, 64], sizes = [8, 32], strides = [1, 1]} : vector<8x96xf32> to vector<8x32xf32>
    %20 = vector.shape_cast %19 : vector<8x32xf32> to vector<8x4x8xf32>
    %21 = tpu.transpose %20, [1, 0, 2] : vector<8x4x8xf32> -> vector<4x8x8xf32>
    "tpu.trace_start"() <{level = 10 : i32, message = "hqd,hkd->hqk"}> : () -> ()
    %cst_9 = arith.constant dense<0.000000e+00> : vector<4x8x8xf32>
    %22 = tpu.matmul %15, %18, %cst_9 {dimension_numbers = #tpu.dot_dimension_numbers<[2], [2], [1], [1], [0, 0, 0, 1, 1, 1], [0], [0]>} : vector<4x8x8xf32>, vector<4x8x8xf32>, vector<4x8x8xf32> -> vector<4x8x8xf32>
    "tpu.trace_stop"() : () -> ()
    %c0_10 = arith.constant 0 : index
    %c0_11 = arith.constant 0 : index
    %c0_12 = arith.constant 0 : index
    %23 = vector.load %arg3[%c0_10, %c0_11, %c0_12] : memref<1x1x8xf32, #tpu.memory_space<vmem>>, vector<1x1x8xf32>
    %24 = vector.shape_cast %23 : vector<1x1x8xf32> to vector<1x8xf32>
    %25 = vector.shape_cast %24 : vector<1x8xf32> to vector<1x1x8xf32>
    %26 = vector.broadcast %25 : vector<1x1x8xf32> to vector<4x8x8xf32>
    %27 = arith.addf %22, %26 : vector<4x8x8xf32>
    %cst_13 = arith.constant dense<0xFF800000> : vector<4x8xf32>
    %28 = vector.multi_reduction <maximumf>, %27, %cst_13 [2] : vector<4x8x8xf32> to vector<4x8xf32>
    %29 = vector.shape_cast %28 : vector<4x8xf32> to vector<4x8x1xf32>
    %30 = vector.broadcast %29 : vector<4x8x1xf32> to vector<4x8x8xf32>
    %31 = arith.subf %27, %30 : vector<4x8x8xf32>
    %32 = math.exp %31 : vector<4x8x8xf32>
    %cst_14 = arith.constant dense<0.000000e+00> : vector<4x8xf32>
    %33 = vector.multi_reduction <add>, %32, %cst_14 [2] : vector<4x8x8xf32> to vector<4x8xf32>
    %34 = vector.shape_cast %33 : vector<4x8xf32> to vector<4x8x1xf32>
    %35 = tpu.reciprocal %34 : vector<4x8x1xf32> -> vector<4x8x1xf32>
    "tpu.trace_start"() <{level = 10 : i32, message = "hqk,hkd->hqd"}> : () -> ()
    %cst_15 = arith.constant dense<0.000000e+00> : vector<4x8x8xf32>
    %36 = tpu.matmul %32, %21, %cst_15 {dimension_numbers = #tpu.dot_dimension_numbers<[2], [1], [1], [2], [0, 0, 0, 1, 1, 2], [0], [0]>} : vector<4x8x8xf32>, vector<4x8x8xf32>, vector<4x8x8xf32> -> vector<4x8x8xf32>
    "tpu.trace_stop"() : () -> ()
    %37 = vector.broadcast %35 : vector<4x8x1xf32> to vector<4x8x8xf32>
    %38 = arith.mulf %36, %37 : vector<4x8x8xf32>
    %39 = tpu.transpose %38, [1, 0, 2] : vector<4x8x8xf32> -> vector<8x4x8xf32>
    %40 = vector.shape_cast %39 : vector<8x4x8xf32> to vector<8x32xf32>
    %c0_16 = arith.constant 0 : index
    %c0_17 = arith.constant 0 : index
    %c0_18 = arith.constant 0 : index
    %41 = vector.load %arg6[%c0_16, %c0_17, %c0_18] : memref<1x32x32xf32, #tpu.memory_space<vmem>>, vector<1x32x32xf32>
    %42 = vector.shape_cast %41 : vector<1x32x32xf32> to vector<32x32xf32>
    %cst_19 = arith.constant dense<0.000000e+00> : vector<8x32xf32>
    %43 = tpu.matmul %40, %42, %cst_19 {dimension_numbers = #tpu.dot_dimension_numbers<[1], [0], [0], [1], [0, 0, 1, 1], [], []>} : vector<8x32xf32>, vector<32x32xf32>, vector<8x32xf32> -> vector<8x32xf32>
    %c0_20 = arith.constant 0 : index
    %c0_21 = arith.constant 0 : index
    %c0_22 = arith.constant 0 : index
    %44 = vector.load %arg7[%c0_20, %c0_21, %c0_22] : memref<1x1x32xf32, #tpu.memory_space<vmem>>, vector<1x1x32xf32>
    %45 = vector.shape_cast %44 : vector<1x1x32xf32> to vector<1x32xf32>
    %46 = vector.broadcast %45 : vector<1x32xf32> to vector<8x32xf32>
    %47 = arith.addf %43, %46 : vector<8x32xf32>
    %48 = arith.addf %3, %47 : vector<8x32xf32>
    %c0_23 = arith.constant 0 : index
    %c0_24 = arith.constant 0 : index
    %c0_25 = arith.constant 0 : index
    %49 = vector.load %arg12[%c0_23, %c0_24, %c0_25] : memref<1x1x32xf32, #tpu.memory_space<vmem>>, vector<1x1x32xf32>
    %50 = vector.shape_cast %49 : vector<1x1x32xf32> to vector<1x32xf32>
    %c0_26 = arith.constant 0 : index
    %c0_27 = arith.constant 0 : index
    %c0_28 = arith.constant 0 : index
    %51 = vector.load %arg13[%c0_26, %c0_27, %c0_28] : memref<1x1x32xf32, #tpu.memory_space<vmem>>, vector<1x1x32xf32>
    %52 = vector.shape_cast %51 : vector<1x1x32xf32> to vector<1x32xf32>
    %cst_29 = arith.constant dense<0.000000e+00> : vector<8xf32>
    %53 = vector.multi_reduction <add>, %48, %cst_29 [1] : vector<8x32xf32> to vector<8xf32>
    %54 = vector.shape_cast %53 : vector<8xf32> to vector<8x1xf32>
    %cst_30 = arith.constant 3.200000e+01 : f32
    %55 = vector.broadcast %cst_30 : f32 to vector<8x1xf32>
    %56 = arith.divf %54, %55 : vector<8x1xf32>
    %57 = vector.broadcast %56 : vector<8x1xf32> to vector<8x32xf32>
    %58 = arith.subf %48, %57 : vector<8x32xf32>
    %59 = arith.mulf %58, %58 : vector<8x32xf32>
    %cst_31 = arith.constant dense<0.000000e+00> : vector<8xf32>
    %60 = vector.multi_reduction <add>, %59, %cst_31 [1] : vector<8x32xf32> to vector<8xf32>
    %61 = vector.shape_cast %60 : vector<8xf32> to vector<8x1xf32>
    %cst_32 = arith.constant 3.200000e+01 : f32
    %62 = vector.broadcast %cst_32 : f32 to vector<8x1xf32>
    %63 = arith.divf %61, %62 : vector<8x1xf32>
    %64 = vector.broadcast %56 : vector<8x1xf32> to vector<8x32xf32>
    %65 = arith.subf %48, %64 : vector<8x32xf32>
    %cst_33 = arith.constant 9.99999974E-6 : f32
    %66 = vector.broadcast %cst_33 : f32 to vector<8x1xf32>
    %67 = arith.addf %63, %66 : vector<8x1xf32>
    %68 = math.rsqrt %67 : vector<8x1xf32>
    %69 = vector.broadcast %68 : vector<8x1xf32> to vector<8x32xf32>
    %70 = arith.mulf %65, %69 : vector<8x32xf32>
    %71 = vector.broadcast %50 : vector<1x32xf32> to vector<8x32xf32>
    %72 = arith.mulf %70, %71 : vector<8x32xf32>
    %73 = vector.broadcast %52 : vector<1x32xf32> to vector<8x32xf32>
    %74 = arith.addf %72, %73 : vector<8x32xf32>
    %c0_34 = arith.constant 0 : index
    %c0_35 = arith.constant 0 : index
    %c0_36 = arith.constant 0 : index
    %75 = vector.load %arg8[%c0_34, %c0_35, %c0_36] : memref<1x32x64xf32, #tpu.memory_space<vmem>>, vector<1x32x64xf32>
    %76 = vector.shape_cast %75 : vector<1x32x64xf32> to vector<32x64xf32>
    %cst_37 = arith.constant dense<0.000000e+00> : vector<8x64xf32>
    %77 = tpu.matmul %74, %76, %cst_37 {dimension_numbers = #tpu.dot_dimension_numbers<[1], [0], [0], [1], [0, 0, 1, 1], [], []>} : vector<8x32xf32>, vector<32x64xf32>, vector<8x64xf32> -> vector<8x64xf32>
    %c0_38 = arith.constant 0 : index
    %c0_39 = arith.constant 0 : index
    %c0_40 = arith.constant 0 : index
    %78 = vector.load %arg9[%c0_38, %c0_39, %c0_40] : memref<1x1x64xf32, #tpu.memory_space<vmem>>, vector<1x1x64xf32>
    %79 = vector.shape_cast %78 : vector<1x1x64xf32> to vector<1x64xf32>
    %80 = vector.broadcast %79 : vector<1x64xf32> to vector<8x64xf32>
    %81 = arith.addf %77, %80 : vector<8x64xf32>
    %cst_41 = arith.constant 5.000000e-01 : f32
    %82 = vector.broadcast %cst_41 : f32 to vector<8x64xf32>
    %83 = arith.mulf %82, %81 : vector<8x64xf32>
    %cst_42 = arith.constant 0.707106769 : f32
    %84 = vector.broadcast %cst_42 : f32 to vector<8x64xf32>
    %85 = arith.mulf %81, %84 : vector<8x64xf32>
    %86 = math.erf %85 : vector<8x64xf32>
    %cst_43 = arith.constant 1.000000e+00 : f32
    %87 = vector.broadcast %cst_43 : f32 to vector<8x64xf32>
    %88 = arith.addf %87, %86 : vector<8x64xf32>
    %89 = arith.mulf %83, %88 : vector<8x64xf32>
    %c0_44 = arith.constant 0 : index
    %c0_45 = arith.constant 0 : index
    %c0_46 = arith.constant 0 : index
    %90 = vector.load %arg10[%c0_44, %c0_45, %c0_46] : memref<1x64x32xf32, #tpu.memory_space<vmem>>, vector<1x64x32xf32>
    %91 = vector.shape_cast %90 : vector<1x64x32xf32> to vector<64x32xf32>
    %cst_47 = arith.constant dense<0.000000e+00> : vector<8x32xf32>
    %92 = tpu.matmul %89, %91, %cst_47 {dimension_numbers = #tpu.dot_dimension_numbers<[1], [0], [0], [1], [0, 0, 1, 1], [], []>} : vector<8x64xf32>, vector<64x32xf32>, vector<8x32xf32> -> vector<8x32xf32>
    %c0_48 = arith.constant 0 : index
    %c0_49 = arith.constant 0 : index
    %c0_50 = arith.constant 0 : index
    %93 = vector.load %arg11[%c0_48, %c0_49, %c0_50] : memref<1x1x32xf32, #tpu.memory_space<vmem>>, vector<1x1x32xf32>
    %94 = vector.shape_cast %93 : vector<1x1x32xf32> to vector<1x32xf32>
    %95 = vector.broadcast %94 : vector<1x32xf32> to vector<8x32xf32>
    %96 = arith.addf %92, %95 : vector<8x32xf32>
    %97 = arith.addf %74, %96 : vector<8x32xf32>
    %c0_51 = arith.constant 0 : index
    %c0_52 = arith.constant 0 : index
    %c0_53 = arith.constant 0 : index
    %98 = vector.load %arg14[%c0_51, %c0_52, %c0_53] : memref<1x1x32xf32, #tpu.memory_space<vmem>>, vector<1x1x32xf32>
    %99 = vector.shape_cast %98 : vector<1x1x32xf32> to vector<1x32xf32>
    %c0_54 = arith.constant 0 : index
    %c0_55 = arith.constant 0 : index
    %c0_56 = arith.constant 0 : index
    %100 = vector.load %arg15[%c0_54, %c0_55, %c0_56] : memref<1x1x32xf32, #tpu.memory_space<vmem>>, vector<1x1x32xf32>
    %101 = vector.shape_cast %100 : vector<1x1x32xf32> to vector<1x32xf32>
    %cst_57 = arith.constant dense<0.000000e+00> : vector<8xf32>
    %102 = vector.multi_reduction <add>, %97, %cst_57 [1] : vector<8x32xf32> to vector<8xf32>
    %103 = vector.shape_cast %102 : vector<8xf32> to vector<8x1xf32>
    %cst_58 = arith.constant 3.200000e+01 : f32
    %104 = vector.broadcast %cst_58 : f32 to vector<8x1xf32>
    %105 = arith.divf %103, %104 : vector<8x1xf32>
    %106 = vector.broadcast %105 : vector<8x1xf32> to vector<8x32xf32>
    %107 = arith.subf %97, %106 : vector<8x32xf32>
    %108 = arith.mulf %107, %107 : vector<8x32xf32>
    %cst_59 = arith.constant dense<0.000000e+00> : vector<8xf32>
    %109 = vector.multi_reduction <add>, %108, %cst_59 [1] : vector<8x32xf32> to vector<8xf32>
    %110 = vector.shape_cast %109 : vector<8xf32> to vector<8x1xf32>
    %cst_60 = arith.constant 3.200000e+01 : f32
    %111 = vector.broadcast %cst_60 : f32 to vector<8x1xf32>
    %112 = arith.divf %110, %111 : vector<8x1xf32>
    %113 = vector.broadcast %105 : vector<8x1xf32> to vector<8x32xf32>
    %114 = arith.subf %97, %113 : vector<8x32xf32>
    %cst_61 = arith.constant 9.99999974E-6 : f32
    %115 = vector.broadcast %cst_61 : f32 to vector<8x1xf32>
    %116 = arith.addf %112, %115 : vector<8x1xf32>
    %117 = math.rsqrt %116 : vector<8x1xf32>
    %118 = vector.broadcast %117 : vector<8x1xf32> to vector<8x32xf32>
    %119 = arith.mulf %114, %118 : vector<8x32xf32>
    %120 = vector.broadcast %99 : vector<1x32xf32> to vector<8x32xf32>
    %121 = arith.mulf %119, %120 : vector<8x32xf32>
    %122 = vector.broadcast %101 : vector<1x32xf32> to vector<8x32xf32>
    %123 = arith.addf %121, %122 : vector<8x32xf32>
    %c0_62 = arith.constant 0 : index
    %c0_63 = arith.constant 0 : index
    %124 = vector.load %arg16[%c0_62, %c0_63] : memref<8x32xf32, #tpu.memory_space<vmem>>, vector<8x32xf32>
    tpu.vector_store %arg16[%c0_62, %c0_63], %123 {strides = array<i32>} : memref<8x32xf32, #tpu.memory_space<vmem>>, vector<8x32xf32>,
    return
  }
  func.func @transform_0(%arg0: i32, %arg1: i32) -> (i32, i32) {
    %c0_i32 = arith.constant 0 : i32
    %c0_i32_0 = arith.constant 0 : i32
    return %arg0, %c0_i32 : i32, i32
  }
  func.func @transform_1(%arg0: i32, %arg1: i32) -> (i32, i32, i32) {
    %c0_i32 = arith.constant 0 : i32
    %c0_i32_0 = arith.constant 0 : i32
    %c0_i32_1 = arith.constant 0 : i32
    return %arg0, %c0_i32, %c0_i32_0 : i32, i32, i32
  }
  func.func @transform_2(%arg0: i32, %arg1: i32) -> (i32, i32, i32) {
    %c0_i32 = arith.constant 0 : i32
    %c0_i32_0 = arith.constant 0 : i32
    %c0_i32_1 = arith.constant 0 : i32
    return %arg1, %c0_i32, %c0_i32_0 : i32, i32, i32
  }
  func.func @transform_3(%arg0: i32, %arg1: i32) -> (i32, i32, i32) {
    %c0_i32 = arith.constant 0 : i32
    %c0_i32_0 = arith.constant 0 : i32
    %c0_i32_1 = arith.constant 0 : i32
    return %arg1, %c0_i32, %c0_i32_0 : i32, i32, i32
  }
  func.func @transform_4(%arg0: i32, %arg1: i32) -> (i32, i32, i32) {
    %c0_i32 = arith.constant 0 : i32
    %c0_i32_0 = arith.constant 0 : i32
    %c0_i32_1 = arith.constant 0 : i32
    return %arg1, %c0_i32, %c0_i32_0 : i32, i32, i32
  }
  func.func @transform_5(%arg0: i32, %arg1: i32) -> (i32, i32, i32) {
    %c0_i32 = arith.constant 0 : i32
    %c0_i32_0 = arith.constant 0 : i32
    %c0_i32_1 = arith.constant 0 : i32
    return %arg1, %c0_i32, %c0_i32_0 : i32, i32, i32
  }
  func.func @transform_6(%arg0: i32, %arg1: i32) -> (i32, i32, i32) {
    %c0_i32 = arith.constant 0 : i32
    %c0_i32_0 = arith.constant 0 : i32
    %c0_i32_1 = arith.constant 0 : i32
    return %arg1, %c0_i32, %c0_i32_0 : i32, i32, i32
  }
  func.func @transform_7(%arg0: i32, %arg1: i32) -> (i32, i32, i32) {
    %c0_i32 = arith.constant 0 : i32
    %c0_i32_0 = arith.constant 0 : i32
    %c0_i32_1 = arith.constant 0 : i32
    return %arg1, %c0_i32, %c0_i32_0 : i32, i32, i32
  }
  func.func @transform_8(%arg0: i32, %arg1: i32) -> (i32, i32, i32) {
    %c0_i32 = arith.constant 0 : i32
    %c0_i32_0 = arith.constant 0 : i32
    %c0_i32_1 = arith.constant 0 : i32
    return %arg1, %c0_i32, %c0_i32_0 : i32, i32, i32
  }
  func.func @transform_9(%arg0: i32, %arg1: i32) -> (i32, i32, i32) {
    %c0_i32 = arith.constant 0 : i32
    %c0_i32_0 = arith.constant 0 : i32
    %c0_i32_1 = arith.constant 0 : i32
    return %arg1, %c0_i32, %c0_i32_0 : i32, i32, i32
  }
  func.func @transform_10(%arg0: i32, %arg1: i32) -> (i32, i32, i32) {
    %c0_i32 = arith.constant 0 : i32
    %c0_i32_0 = arith.constant 0 : i32
    %c0_i32_1 = arith.constant 0 : i32
    return %arg1, %c0_i32, %c0_i32_0 : i32, i32, i32
  }
  func.func @transform_11(%arg0: i32, %arg1: i32) -> (i32, i32, i32) {
    %c0_i32 = arith.constant 0 : i32
    %c0_i32_0 = arith.constant 0 : i32
    %c0_i32_1 = arith.constant 0 : i32
    return %arg1, %c0_i32, %c0_i32_0 : i32, i32, i32
  }
  func.func @transform_12(%arg0: i32, %arg1: i32) -> (i32, i32, i32) {
    %c0_i32 = arith.constant 0 : i32
    %c0_i32_0 = arith.constant 0 : i32
    %c0_i32_1 = arith.constant 0 : i32
    return %arg1, %c0_i32, %c0_i32_0 : i32, i32, i32
  }
  func.func @transform_13(%arg0: i32, %arg1: i32) -> (i32, i32, i32) {
    %c0_i32 = arith.constant 0 : i32
    %c0_i32_0 = arith.constant 0 : i32
    %c0_i32_1 = arith.constant 0 : i32
    return %arg1, %c0_i32, %c0_i32_0 : i32, i32, i32
  }
  func.func @transform_14(%arg0: i32, %arg1: i32) -> (i32, i32) {
    %c0_i32 = arith.constant 0 : i32
    %c0_i32_0 = arith.constant 0 : i32
    return %arg0, %c0_i32 : i32, i32
  }
}

</mosaic_0001>

<bundles_post_ra>
// kernel: encoder_forward.1
= control target key start
LH: loop header
LB: loop body
LE: loop exit
PB: predicated region body
PF: predicated region fallthrough
CT: control target
= control target key end

     0   :  { %s2186_s29 = smov 0   ;;  %s2188_s30 = smov 0   ;;  %s2608_s0 = inlined_call_operand.vmem [shape: f32[16,32], index: 0, kind: input, shape index: {}, may-alias: {0,14}]   ;;  %s2609_s1 = inlined_call_operand.vmem [shape: f32[2,1,8], index: 1, kind: input, shape index: {}]   ;;  %s2610_s2 = inlined_call_operand.vmem [shape: f32[2,32,96], index: 2, kind: input, shape index: {}]   ;;  %s2611_s3 = inlined_call_operand.vmem [shape: f32[2,1,96], index: 3, kind: input, shape index: {}]   ;;  %s2612_s4 = inlined_call_operand.vmem [shape: f32[2,32,32], index: 4, kind: input, shape index: {}]   ;;  %s2613_s5 = inlined_call_operand.vmem [shape: f32[2,1,32], index: 5, kind: input, shape index: {}]   ;;  %s2614_s6 = inlined_call_operand.vmem [shape: f32[2,32,64], index: 6, kind: input, shape index: {}]   ;;  %s2615_s7 = inlined_call_operand.vmem [shape: f32[2,1,64], index: 7, kind: input, shape index: {}]   ;;  %s2616_s8 = inlined_call_operand.vmem [shape: f32[2,64,32], index: 8, kind: input, shape index: {}]   ;;  %s2617_s9 = inlined_call_operand.vmem [shape: f32[2,1,32], index: 9, kind: input, shape index: {}]   ;;  %s2618_s10 = inlined_call_operand.vmem [shape: f32[2,1,32], index: 10, kind: input, shape index: {}]   ;;  %s2619_s11 = inlined_call_operand.vmem [shape: f32[2,1,32], index: 11, kind: input, shape index: {}]   ;;  %s2620_s12 = inlined_call_operand.vmem [shape: f32[2,1,32], index: 12, kind: input, shape index: {}]   ;;  %s2621_s13 = inlined_call_operand.vmem [shape: f32[2,1,32], index: 13, kind: input, shape index: {}]   ;;  %s2622_s14 = inlined_call_operand.vmem [shape: f32[16,32], index: 14, kind: output, shape index: {}, may-alias: {0,14}]  }
   0x1   :  { %2628 = sst [smem:[#allocation9_spill]] %s2608_s0  ;;  %s2190_s15 = smov 0  }
   0x2   :  { %2629 = sst [smem:[#allocation10_spill]] %s2610_s2  ;;  %s2192_s16 = smov 0  }
   0x3   :  { %2630 = sst [smem:[#allocation11_spill]] %s2611_s3  ;;  %s2194_s17 = smov 0  }
   0x4   :  { %2631 = sst [smem:[#allocation12_spill]] %s2612_s4 }
   0x5   :  { %2632 = sst [smem:[#allocation13_spill]] %s2614_s6 }
   0x6   :  { %2633 = sst [smem:[#allocation14_spill]] %s2615_s7 }
   0x7   :  { %2634 = sst [smem:[#allocation15_spill]] %s2616_s8 }
   0x8   :  { %2635 = sst [smem:[#allocation16_spill]] %s2617_s9 }
   0x9   :  { %2636 = sst [smem:[#allocation17_spill]] %s2620_s12 }
   0xa   :  { %2637 = sst [smem:[#allocation18_spill]] %s2621_s13 }
   0xb   :  { %2638 = sst [smem:[#allocation19_spill]] %s2622_s14 }
   0xc LB: > { %2639 = sst [smem:[#allocation2_spill]] %s2082_s29  ;;  %s33_s18 = sadd.s32 1, %s2090_s15  ;;  %s2098_s17 = sphi %s2194_s17, %s24_s17   ;;  %s2094_s16 = sphi %s2192_s16, %s2671_s16   ;;  %s2090_s15 = sphi %s2190_s15, %s2670_s15   ;;  %s2086_s30 = sphi %s2188_s30, %s2669_s30   ;;  %s2082_s29 = sphi %s2186_s29, %s2668_s29  }
   0xd   : > { %2640 = sst [smem:[#allocation3_spill]] %s2090_s15  ;;  %s36_s19 = sadd.s32 1, %s2094_s16 }
   0xe   : > { %2641 = sst [smem:[#allocation4_spill]] %s2094_s16  ;;  %p34_p0 = scmp.ge.s32.totalorder %s33_s18, 2 }
   0xf   : > { %2642 = sst [smem:[#allocation5_spill]] %s2098_s17  ;;  %p1931_p1 = scmp.ge.s32.totalorder %s2098_s17, 1 }
  0x10   : > { %p535_p2 = scmp.lt.s32.totalorder %s2098_s17, 5  ;;  %s2673_s18 = smov (%p34_p0, %s33_s18), 0 }
  0x11   : > { %2643 = sst [smem:[#allocation6_spill]] %s2673_s18  ;;  %s2675_s19 = smov (!%p34_p0, %s36_s19), %s2094_s16 }
  0x12   : > { %p536_p3 = pnand %p1931_p1, %p535_p2  ;;  %p38_p4 = scmp.ge.s32.totalorder %s2675_s19, 2 }
  0x14   : > { %s2677_s19 = smov (%p38_p4, %s2675_s19), 0  ;;  %539 = sbr.rel (%p536_p3) target bundleno = 2000 (0x7d0), region = 76 }
  0x15   : > { %2644 = sst [smem:[#allocation7_spill]] %s2677_s19 }
  0x19   : > { %p626_p5 = scmp.lt.s32.totalorder %s2086_s30, 1  ;;  %p633_p6 = scmp.lt.s32.totalorder %s2082_s29, 1 }
  0x1a   : > { %s2645_s0 = sld [smem:[#allocation9_spill]] }
  0x1b   : > { %s2679_s30 = smov (!%p626_p5, %s2086_s30), 1  ;;  %s2646_s2 = sld [smem:[#allocation10_spill]] }
  0x1c   : > { %s2222_s20 = scalar_select %p633_p6, %s2082_s29, 1 }
  0x1d   : > { %s1932_s21 = sshll.u32 %s2679_s30, 3  ;;  %s2647_s3 = sld [smem:[#allocation11_spill]] }
  0x1e   : > { %s1962_s28 = sshll.u32 %s2222_s20, 5  ;;  %s2648_s4 = sld [smem:[#allocation12_spill]] }
  0x1f   : > { %s2650_s6 = sld [smem:[#allocation13_spill]]  ;;  %s1965_s15 = sshll.u32 %s2222_s20, 6 }
  0x20   : > { %s629_s27 = scalar_lea.vmem %s2645_s0, %s1932_s21  ;;  %s2653_s8 = sld [smem:[#allocation15_spill]] }
  0x21   : > { %s637_s16 = scalar_lea.vmem %s2646_s2, %s1962_s28  ;;  %s667_s25 = scalar_lea.vmem %s2618_s10, %s2222_s20 }
  0x22   : > { %s670_s24 = scalar_lea.vmem %s2619_s11, %s2222_s20  ;;  %s2654_s2 = sld [smem:[#allocation17_spill]] }
  0x23   : > { %s640_s29 = scalar_lea.vmem %s2647_s3, %s2222_s20  ;;  %s2655_s17 = sld [smem:[#allocation18_spill]] }
  0x24   : > { %s2243_s12 = scalar_lea.vmem %s2648_s4, %s1962_s28 }
  0x25   : > { %2649 = sst [smem:[#allocation8_spill]] %s2243_s12  ;;  %s2252_s0 = scalar_lea.vmem %s2650_s6, %s1962_s28 }
  0x26   : > { %s2266_s12 = scalar_lea.vmem %s2653_s8, %s1965_s15  ;;  %s2656_s15 = sld [smem:[#allocation19_spill]] }
  0x27   : > { %s2657_s8 = sld [smem:[#allocation2_spill]] }
  0x28   : > { %s673_s6 = scalar_lea.vmem %s2654_s2, %s2222_s20 }
  0x29   : > { %s676_s13 = scalar_lea.vmem %s2655_s17, %s2222_s20 }
  0x2c   : > { %s2287_s14 = scalar_lea.vmem %s2656_s15, %s1932_s21 }
  0x2d   : > { %p1942_p7 = scmp.ne.s32.totalorder %s2657_s8, 0 }
  0x2f   : > { %684 = sbr.rel (%p1942_p7) target bundleno = 54 (0x36), region = 80 }
  0x34   : > { %v685_v0 = vld [vmem:[%s629_s27] sm:$0xff]  ;;  %vm686_vm0 = vcmask 261120  }
  0x35   : > { %687 = vst.msk [vmem:[%s2287_s14] sm:$0xff] %vm686_vm0, %v685_v0 }
  0x36 PF: > { %v692_v1 = vld [vmem:[%s637_s16 + $0x18] sm:$0xff]  ;;  %v691_v2 = vld [vmem:[%s637_s16 + $0x10] sm:$0xff]  ;;  %v690_v3 = vld [vmem:[%s637_s16 + $0x8] sm:$0xff]  ;;  %vm697_vm1 = vcmask 261120   ;;  %s2100_s2 = smov 104   ;;  %s2101_s7 = smov 120  }
  0x37   : > { %713 = vmatpush.msra.mxu0 %v692_v1  ;;  %v689_v4 = vld [vmem:[%s637_s16] sm:$0xff]  ;;  %s2102_s8 = smov 96   ;;  %s2103_s9 = smov 112   ;;  %v2105_v18 = vmov 1983009808   ;;  %vm733_vm2 = vcmask 1047556  }
  0x38   : > { %v2027_v6 = vld [vmem:[%s640_s29] ss:$0 sm:$0xff]  ;;  %s2104_s16 = smov 64   ;;  %v738_v19 = vunpack.c.l.s4 %v2105_v18  ;;  %v2106_v30 = vmov 1934713408   ;;  %vm1098_vm3 = vcmask 64512   ;;  %s2658_s27 = scalar_lea.vmem %s2609_s1, %s2679_s30 }
  0x39   : > { %714 = vmatpush.msra.mxu0 %v691_v2  ;;  %v762_v31 = vunpack.c.l.s4 %v2106_v30  ;;  %s2659_s30 = sld [smem:[#allocation8_spill]]  ;;  %s2107_s22 = smov 16  }
  0x3a   : > { %v2298_v26 = vunpack.c.0.s8 %v738_v19  ;;  %s2108_s23 = smov 24   ;;  %s2109_s28 = smov 8  }
  0x3b   : > { %715 = vmatpush.msra.mxu0 %v690_v3  ;;  %v2313_v39 = vunpack.c.0.s8 %v762_v31  ;;  %s2660_s19 = scalar_lea.vmem %s2613_s5, %s2222_s20 }
  0x3c   : > { %v2292_v5 = vld [vmem:[%s2287_s14] sm:$0xff] }
  0x3d   : > { %716 = vmatpush.msra.mxu0 %v689_v4 }
  0x3e   : > { %1943 = vmatmul.msk.f32.vlgmr.msra.gmra.mxu0 %vm697_vm1, %v2292_v5 }
  0xbb   : > { %v718_v7 = vpop.f32.mrf.mxu0 }
  0xbc   : > { %v719_v8 = vadd.f32 %v2027_v6, %v718_v7 }
  0xbe   : > { %848 = vrot.lane.b32.xlu1 %v719_v8, %s2100_s2  ;;  %844 = vrot.lane.b32.xlu0 %v719_v8, %s2101_s7  ;;  %v721_v9 = vmul.f32 0.35355338, %v719_v8 }
  0xc0   : > { %v735_v24 = vrot.slane %v721_v9, 4 }
  0xc6   : > { %850 = vrot.lane.b32.xlu1 %v719_v8, %s2102_s8  ;;  %846 = vrot.lane.b32.xlu0 %v719_v8, %s2103_s9 }
  0xce   : > { %723 = vrot.lane.b32.xlu1 %v721_v9, %s2101_s7  ;;  %s2661_s7 = sld [smem:[#allocation14_spill]] }
 0x130   : > { %v849_v10 = vpop.permute.xlu1 %848  ;;  %v845_v11 = vpop.permute.xlu0 %844 }
 0x131   : > { %v2017_v12 = vpack.i.bf16 %v845_v11, %v719_v8  ;;  %856 = vrot.lane.b32.xlu0 %v849_v10, %s2102_s8  ;;  %852 = vrot.lane.b32.xlu2 %v845_v11, %s2102_s8 }
 0x133   : > { %2018 = vrot.lane.b32.xlu1 %v2017_v12, %s2104_s16 }
 0x138   : > { %v847_v13 = vpop.permute.xlu0 %846  ;;  %v851_v16 = vpop.permute.xlu1 %850 }
 0x139   : > { %854 = vrot.lane.b32.xlu2 %v847_v13, %s2102_s8  ;;  %729 = vrot.lane.b32.xlu0 %v721_v9, %s2100_s2  ;;  %v2022_v14 = vpack.i.bf16 %v849_v10, %v847_v13  ;;  %v864_v22 = vrot.slane %v851_v16, 4  ;;  %s2662_s8 = scalar_lea.vmem %s2661_s7, %s2222_s20 }
 0x140   : > { %v2296_v25 = vpop.permute.xlu1 %723 }
 0x141   : > { %726 = vrot.lane.b32.xlu2 %v721_v9, %s2103_s9  ;;  %v747_v37 = vrot.slane %v2296_v25, 4 }
 0x149   : > { %2023 = vrot.lane.b32.xlu2 %v2022_v14, %s2104_s16 }
 0x18b   : > { %v853_v15 = vpop.permute.xlu2 %852 }
 0x18c   : > { %v876_v36 = vrot.slane %v853_v15, 4 }
 0x193   : > { %v855_v17 = vpop.permute.xlu2 %854 }
 0x194   : > { %v862_v20 = vrot.slane %v855_v17, 4  ;;  %v865_v28 = vsel %vm733_vm2, %v855_v17, %v864_v22 }
 0x195   : > { %v873_v34 = vperm.slane %v865_v28, %v2298_v26 }
 0x196   : > { %v863_v27 = vsel %vm733_vm2, %v862_v20, %v851_v16 }
 0x197   : > { %v869_v33 = vperm.slane %v863_v27, %v2298_v26  ;;  %v900_v47 = vrot.slane %v873_v34, 4 }
 0x199   : > { %v888_v46 = vrot.slane %v869_v33, 4 }
 0x19b   : > { %v727_v21 = vpop.permute.xlu2 %726 }
 0x19c   : > { %v732_v23 = vrot.slane %v727_v21, 4  ;;  %v736_v29 = vsel %vm733_vm2, %v727_v21, %v735_v24 }
 0x19d   : > { %v2307_v35 = vperm.slane %v736_v29, %v2298_v26 }
 0x19e   : > { %v734_v32 = vsel %vm733_vm2, %v732_v23, %v721_v9 }
 0x19f   : > { %v2311_v38 = vperm.slane %v734_v32, %v2298_v26  ;;  %v771_v48 = vrot.slane %v2307_v35, 4 }
 0x1a1   : > { %v759_v59 = vrot.slane %v2311_v38, 4 }
 0x1a3   : > { %v857_v40 = vpop.permute.xlu0 %856  ;;  %v2024_v41 = vpop.permute.xlu2 %2023 }
 0x1a4   : > { %v874_v42 = vrot.slane %v857_v40, 4  ;;  %v877_v43 = vsel %vm733_vm2, %v857_v40, %v876_v36  ;;  %v2026_v44 = vunpack.i.h.bf16 %v2024_v41  ;;  %v2025_v45 = vunpack.i.l.bf16 %v2024_v41 }
 0x1a5   : > { %v885_v49 = vperm.slane %v877_v43, %v2298_v26  ;;  %v2019_v50 = vpop.permute.xlu1 %2018 }
 0x1a6   : > { %v875_v51 = vsel %vm733_vm2, %v874_v42, %v853_v15  ;;  %v996_v52 = vrot.slane %v2026_v44, 4  ;;  %v984_v53 = vrot.slane %v2025_v45, 4  ;;  %v2021_v54 = vunpack.i.h.bf16 %v2019_v50 }
 0x1a7   : > { %v881_v55 = vperm.slane %v875_v51, %v2298_v26  ;;  %v898_v56 = vrot.slane %v885_v49, 4  ;;  %v901_v57 = vsel %vm733_vm2, %v885_v49, %v900_v47  ;;  %v2020_v58 = vunpack.i.l.bf16 %v2019_v50 }
 0x1a8   : > { %v909_v60 = vperm.slane %v901_v57, %v2313_v39  ;;  %v997_v61 = vsel %vm733_vm2, %v996_v52, %v2021_v54  ;;  %v998_v62 = vrot.slane %v2021_v54, 4 }
 0x1a9   : > { %v886_v63 = vrot.slane %v881_v55, 4  ;;  %v889_v0 = vsel %vm733_vm2, %v881_v55, %v888_v46  ;;  %v899_v1 = vsel %vm733_vm2, %v898_v56, %v873_v34  ;;  %v1003_v2 = vperm.slane %v997_v61, %v2298_v26 }
 0x1aa   : > { %v897_v3 = vperm.slane %v889_v0, %v2313_v39  ;;  %v905_v4 = vperm.slane %v899_v1, %v2313_v39  ;;  %v916_v6 = vrot.slane %v909_v60, 4  ;;  %v999_v7 = vsel %vm733_vm2, %v2026_v44, %v998_v62 }
 0x1ab   : > { %v887_v8 = vsel %vm733_vm2, %v886_v63, %v869_v33  ;;  %v1007_v9 = vperm.slane %v999_v7, %v2298_v26  ;;  %v1008_v10 = vrot.slane %v1003_v2, 4  ;;  %v985_v11 = vsel %vm733_vm2, %v984_v53, %v2020_v58  ;;  %v730_v16 = vpop.permute.xlu0 %729 }
 0x1ac   : > { %v893_v12 = vperm.slane %v887_v8, %v2313_v39  ;;  %v912_v13 = vrot.slane %v897_v3, 4  ;;  %v914_v14 = vrot.slane %v905_v4, 4  ;;  %v2335_v15 = vsel %vm733_vm2, 0.0, %v916_v6 }
 0x1ad   : > { %v929_v17 = vsel %vm733_vm2, %v916_v6, %v905_v4  ;;  %v934_v18 = vrot.slane %v2335_v15, 4  ;;  %v1020_v19 = vrot.slane %v1007_v9, 4  ;;  %v986_v20 = vrot.slane %v2020_v58, 4 }
 0x1ae   : > { %v913_v21 = vsel %vm733_vm2, 0.0, %v912_v13  ;;  %v915_v22 = vsel %vm733_vm2, 0.0, %v914_v14  ;;  %v2342_v23 = vperm.slane %v929_v17, %v2298_v26  ;;  %v991_v24 = vperm.slane %v985_v11, %v2298_v26 }
 0x1af   : > { %v923_v27 = vrot.slane %v913_v21, 4  ;;  %v987_v28 = vsel %vm733_vm2, %v2025_v45, %v986_v20  ;;  %v745_v29 = vrot.slane %v730_v16, 4  ;;  %v748_v30 = vsel %vm733_vm2, %v730_v16, %v747_v37 }
 0x1b0   : > { %v995_v31 = vperm.slane %v987_v28, %v2298_v26  ;;  %v1009_v32 = vsel %vm733_vm2, %v1008_v10, %v991_v24  ;;  %v1010_v33 = vrot.slane %v991_v24, 4  ;;  %v756_v34 = vperm.slane %v748_v30, %v2298_v26 }
 0x1b1   : > { %v2351_v36 = vperm.slane %v1009_v32, %v2313_v39  ;;  %v746_v40 = vsel %vm733_vm2, %v745_v29, %v2296_v25  ;;  %v910_v41 = vrot.slane %v893_v12, 4  ;;  %v918_v42 = vsel %vm733_vm2, %v912_v13, %v893_v12 }
 0x1b2   : > { %v1011_v43 = vsel %vm733_vm2, %v1003_v2, %v1010_v33  ;;  %v1021_v37 = vsel %vm733_vm2, %v1020_v19, %v995_v31  ;;  %v1022_v44 = vrot.slane %v995_v31, 4  ;;  %v752_v45 = vperm.slane %v746_v40, %v2298_v26 }
 0x1b3   : > { %v1019_v46 = vperm.slane %v1011_v43, %v2313_v39  ;;  %v2361_v47 = vperm.slane %v1021_v37, %v2313_v39  ;;  %v1032_v49 = vrot.slane %v2351_v36, 4  ;;  %v769_v50 = vrot.slane %v756_v34, 4 }
 0x1b4   : > { %v1023_v25 = vsel %vm733_vm2, %v1007_v9, %v1022_v44  ;;  %v757_v51 = vrot.slane %v752_v45, 4  ;;  %v760_v52 = vsel %vm733_vm2, %v752_v45, %v759_v59  ;;  %v772_v53 = vsel %vm733_vm2, %v756_v34, %v771_v48 }
 0x1b5   : > { %v1031_v54 = vperm.slane %v1023_v25, %v2313_v39  ;;  %v1033_v55 = vsel %vm733_vm2, 0.0, %v1032_v49  ;;  %v1034_v56 = vrot.slane %v1019_v46, 4  ;;  %v1036_v57 = vrot.slane %v2361_v47, 4 }
 0x1b6   : > { %v758_v58 = vsel %vm733_vm2, %v757_v51, %v2311_v38  ;;  %v768_v60 = vperm.slane %v760_v52, %v2313_v39  ;;  %v770_v61 = vsel %vm733_vm2, %v769_v50, %v2307_v35  ;;  %v780_v59 = vperm.slane %v772_v53, %v2313_v39 }
 0x1b7   : > { %v1035_v62 = vsel %vm733_vm2, 0.0, %v1034_v56  ;;  %v2379_v48 = vrot.slane %v1031_v54, 4  ;;  %v764_v63 = vperm.slane %v758_v58, %v2313_v39  ;;  %v776_v0 = vperm.slane %v770_v61, %v2313_v39 }
 0x1b8   : > { %v1045_v1 = vrot.slane %v1035_v62, 4  ;;  %v783_v2 = vrot.slane %v768_v60, 4  ;;  %v787_v3 = vrot.slane %v780_v59, 4  ;;  %v911_v38 = vsel %vm733_vm2, 0.0, %v910_v41 }
 0x1b9   : > { %v1039_v4 = vsel %vm733_vm2, 0.0, %v2379_v48  ;;  %v781_v6 = vrot.slane %v764_v63, 4  ;;  %v785_v35 = vrot.slane %v776_v0, 4  ;;  %v922_v7 = vperm.slane %v918_v42, %v2298_v26 }
 0x1ba   : > { %v1056_v8 = vrot.slane %v1039_v4, 4  ;;  %v784_v9 = vsel %vm733_vm2, 0.0, %v783_v2  ;;  %v788_v10 = vsel %vm733_vm2, 0.0, %v787_v3  ;;  %v800_v11 = vsel %vm733_vm2, %v787_v3, %v776_v0 }
 0x1bb   : > { %v786_v12 = vsel %vm733_vm2, 0.0, %v785_v35  ;;  %v794_v13 = vrot.slane %v784_v9, 4  ;;  %v2392_v14 = vperm.slane %v800_v11, %v2298_v26  ;;  %v805_v15 = vrot.slane %v788_v10, 4 }
 0x1bc   : > { %v924_v16 = vsel %vm733_vm2, %v923_v27, %v911_v38  ;;  %v935_v17 = vsel %vm733_vm2, %v934_v18, %v915_v22  ;;  %v942_v19 = vrot.slane %v922_v7, 4  ;;  %v954_v20 = vrot.slane %v2342_v23, 4 }
 0x1bd   : > { %v928_v21 = vperm.slane %v924_v16, %v2298_v26  ;;  %v939_v24 = vperm.slane %v935_v17, %v2298_v26  ;;  %v782_v28 = vsel %vm733_vm2, 0.0, %v781_v6  ;;  %v789_v29 = vsel %vm733_vm2, %v783_v2, %v764_v63 }
 0x1be   : > { %v793_v30 = vperm.slane %v789_v29, %v2298_v26  ;;  %v795_v31 = vsel %vm733_vm2, %v794_v13, %v782_v28  ;;  %v806_v32 = vsel %vm733_vm2, %v805_v15, %v786_v12  ;;  %v825_v27 = vrot.slane %v2392_v14, 4 }
 0x1bf   : > { %v943_v18 = vsel %vm733_vm2, %v928_v21, %v942_v19  ;;  %v955_v22 = vsel %vm733_vm2, %v939_v24, %v954_v20  ;;  %v940_v33 = vrot.slane %v928_v21, 4  ;;  %v952_v34 = vrot.slane %v939_v24, 4 }
 0x1c0   : > { %v951_v40 = vperm.slane %v943_v18, %v2313_v39  ;;  %v963_v41 = vperm.slane %v955_v22, %v2313_v39  ;;  %v799_v42 = vperm.slane %v795_v31, %v2298_v26  ;;  %v810_v43 = vperm.slane %v806_v32, %v2298_v26 }
 0x1c1   : > { %v941_v37 = vsel %vm733_vm2, %v940_v33, %v922_v7  ;;  %v953_v44 = vsel %vm733_vm2, %v952_v34, %v2342_v23  ;;  %v813_v45 = vrot.slane %v793_v30, 4  ;;  %v1037_v46 = vsel %vm733_vm2, 0.0, %v1036_v57 }
 0x1c2   : > { %v968_v49 = vrot.slane %v963_v41, 4  ;;  %v947_v50 = vperm.slane %v941_v37, %v2313_v39  ;;  %v959_v25 = vperm.slane %v953_v44, %v2313_v39  ;;  %v970_v51 = vrot.slane %v951_v40, 4 }
 0x1c3   : > { %v814_v52 = vsel %vm733_vm2, %v799_v42, %v813_v45  ;;  %v826_v53 = vsel %vm733_vm2, %v810_v43, %v825_v27  ;;  %v1040_v54 = vsel %vm733_vm2, %v1034_v56, %v2351_v36  ;;  %v1046_v58 = vsel %vm733_vm2, %v1045_v1, %v1033_v55 }
 0x1c4   : > { %v969_v23 = vsel %vm733_vm2, %v968_v49, %v951_v40  ;;  %v964_v60 = vrot.slane %v959_v25, 4  ;;  %v971_v57 = vsel %vm733_vm2, %v963_v41, %v970_v51  ;;  %v966_v61 = vrot.slane %v947_v50, 4 }
 0x1c5   : > { %1948 = vmatpush.xpose.msk.msra.mxu3 %vm1098_vm3, %v969_v23  ;;  %v822_v59 = vperm.slane %v814_v52, %v2313_v39  ;;  %v834_v62 = vperm.slane %v826_v53, %v2313_v39  ;;  %v1044_v63 = vperm.slane %v1040_v54, %v2298_v26  ;;  %v1050_v0 = vperm.slane %v1046_v58, %v2298_v26 }
 0x1c6   : > { %v965_v36 = vsel %vm733_vm2, %v964_v60, %v947_v50  ;;  %v967_v55 = vsel %vm733_vm2, %v959_v25, %v966_v61  ;;  %v1051_v56 = vsel %vm733_vm2, %v2379_v48, %v2361_v47  ;;  %v1057_v1 = vsel %vm733_vm2, %v1056_v8, %v1037_v46 }
 0x1c7   : > { %1944 = vmatpush.xpose.msk.msra.mxu1 %vm1098_vm3, %v965_v36  ;;  %1946 = vmatpush.xpose.msk.msra.mxu2 %vm1098_vm3, %v967_v55  ;;  %v839_v2 = vrot.slane %v834_v62, 4  ;;  %v1055_v3 = vperm.slane %v1051_v56, %v2298_v26  ;;  %v1061_v38 = vperm.slane %v1057_v1, %v2298_v26  ;;  %v1062_v4 = vrot.slane %v1050_v0, 4 }
 0x1c8   : > { %v811_v6 = vrot.slane %v799_v42, 4  ;;  %v823_v35 = vrot.slane %v810_v43, 4  ;;  %v1064_v7 = vrot.slane %v1044_v63, 4  ;;  %v841_v34 = vrot.slane %v822_v59, 4  ;;  %v2028_v43 = vld [vmem:[%s2658_s27] ss:$0 sm:$0xff] }
 0x1c9   : > { %v840_v9 = vsel %vm733_vm2, %v839_v2, %v822_v59  ;;  %v1063_v47 = vsel %vm733_vm2, %v1062_v4, %v1044_v63  ;;  %v1074_v48 = vrot.slane %v1061_v38, 4  ;;  %v1076_v8 = vrot.slane %v1055_v3, 4 }
 0x1ca   : > { %1949 = vmatmul.msk.f32.vlgmr.msra.gmra.mxu3 %vm1098_vm3, %v840_v9  ;;  %v1069_v10 = vperm.slane %v1063_v47, %v2313_v39  ;;  %v812_v11 = vsel %vm733_vm2, %v811_v6, %v793_v30  ;;  %v824_v12 = vsel %vm733_vm2, %v823_v35, %v2392_v14  ;;  %v1065_v20 = vsel %vm733_vm2, %v1050_v0, %v1064_v7 }
 0x1cb   : > { %1950 = vmatpush.xpose.msk.msrb.mxu1 %vm1098_vm3, %v971_v57  ;;  %v1075_v13 = vsel %vm733_vm2, %v1074_v48, %v1055_v3  ;;  %v818_v15 = vperm.slane %v812_v11, %v2313_v39  ;;  %v830_v16 = vperm.slane %v824_v12, %v2313_v39  ;;  %v1077_v21 = vsel %vm733_vm2, %v1061_v38, %v1076_v8 }
 0x1cc   : > { %v1081_v17 = vperm.slane %v1075_v13, %v2313_v39  ;;  %v1088_v19 = vrot.slane %v1069_v10, 4  ;;  %v1085_v28 = vperm.slane %v1077_v21, %v2313_v39  ;;  %v1073_v32 = vperm.slane %v1065_v20, %v2313_v39 }
 0x1cd   : > { %v835_v24 = vrot.slane %v830_v16, 4  ;;  %v837_v29 = vrot.slane %v818_v15, 4  ;;  %v842_v41 = vsel %vm733_vm2, %v834_v62, %v841_v34 }
 0x1ce   : > { %v1089_v30 = vsel %vm733_vm2, %v1081_v17, %v1088_v19  ;;  %v1086_v14 = vrot.slane %v1081_v17, 4  ;;  %v1090_v27 = vrot.slane %v1085_v28, 4  ;;  %v1092_v40 = vrot.slane %v1073_v32, 4 }
 0x1cf   : > { %1336 = vmatpush.msrb.mxu3 %v1089_v30  ;;  %v836_v31 = vsel %vm733_vm2, %v835_v24, %v818_v15  ;;  %v838_v18 = vsel %vm733_vm2, %v830_v16, %v837_v29 }
 0x1d0   : > { %1945 = vmatmul.msk.f32.vlgmr.msra.gmra.mxu1 %vm1098_vm3, %v836_v31  ;;  %v1087_v22 = vsel %vm733_vm2, %v1086_v14, %v1069_v10  ;;  %1947 = vmatmul.msk.f32.vlgmr.msra.gmra.mxu2 %vm1098_vm3, %v838_v18  ;;  %v1091_v33 = vsel %vm733_vm2, %v1090_v27, %v1073_v32  ;;  %v1093_v42 = vsel %vm733_vm2, %v1085_v28, %v1092_v40 }
 0x1d1   : > { %1313 = vmatpush.msrb.mxu2 %v1087_v22  ;;  %1359 = vmatpush.msra.mxu1 %v1091_v33 }
 0x1d8   : > { %1951 = vmatmul.msk.f32.vlgmr.msrb.gmra.mxu1 %vm1098_vm3, %v842_v41 }
 0x1d9   : > { %1382 = vmatpush.msrb.mxu1 %v1093_v42 }
 0x24d   : > { %v1122_v37 = vpop.f32.mrf.mxu1  ;;  %v1174_v44 = vpop.f32.mrf.mxu3 }
 0x24e   : > { %v1123_v45 = vadd.f32 %v2028_v43, %v1122_v37  ;;  %v1175_v46 = vadd.f32 %v2028_v43, %v1174_v44 }
 0x250   : > { %v1203_v49 = vsel %vm1098_vm3, %v1123_v45, -inf  ;;  %v1209_v50 = vsel %vm1098_vm3, %v1175_v46, -inf }
 0x251   : > { %1204 = vmax.xlane.f32.xlu1 %v1203_v49  ;;  %1210 = vmax.xlane.f32.xlu0 %v1209_v50 }
 0x253   : > { %v1148_v25 = vpop.f32.mrf.mxu2 }
 0x254   : > { %v1149_v51 = vadd.f32 %v2028_v43, %v1148_v25 }
 0x255   : > { %v1200_v53 = vpop.f32.mrf.mxu1 }
 0x256   : > { %v1206_v52 = vsel %vm1098_vm3, %v1149_v51, -inf  ;;  %v1201_v54 = vadd.f32 %v2028_v43, %v1200_v53 }
 0x257   : > { %1207 = vmax.xlane.f32.xlu2 %v1206_v52 }
 0x258   : > { %v1212_v58 = vsel %vm1098_vm3, %v1201_v54, -inf }
 0x25f   : > { %1213 = vmax.xlane.f32.xlu2 %v1212_v58 }
 0x2c4   : > { %v1205_v23 = vpop.xlane.xlu1 %1204  ;;  %v1211_v60 = vpop.xlane.xlu0 %1210 }
 0x2c5   : > { %v1215_v57 = vsub.f32 %v1123_v45, %v1205_v23  ;;  %v1217_v61 = vsub.f32 %v1175_v46, %v1211_v60 }
 0x2c7   : > { %v1219_v59 = vmul.f32 1.442695, %v1215_v57  ;;  %v1223_v62 = vmul.f32 1.442695, %v1217_v61 }
 0x2c9   : > { %2036 = vpow2.f32 %v1219_v59 }
 0x2ca   : > { %2038 = vpow2.f32 %v1223_v62  ;;  %v1208_v63 = vpop.xlane.xlu2 %1207 }
 0x2cb   : > { %v1216_v0 = vsub.f32 %v1149_v51, %v1208_v63 }
 0x2cd   : > { %v1221_v36 = vmul.f32 1.442695, %v1216_v0 }
 0x2cf   : > { %v2037_v55 = vpop.eup %2036  ;;  %2040 = vpow2.f32 %v1221_v36 }
 0x2d0   : > { %v2039_v56 = vpop.eup %2038  ;;  %1952 = vmatmul.msk.f32.vlgmr.msrb.gmra.mxu2 %vm1098_vm3, %v2037_v55  ;;  %v1227_v1 = vsel %vm1098_vm3, %v2037_v55, 0.0 }
 0x2d1   : > { %1228 = vadd.xlane.f32.xlu1 %v1227_v1  ;;  %1954 = vmatmul.msk.f32.vlgmr.msra.gmra.mxu1 %vm1098_vm3, %v2039_v56  ;;  %v1233_v2 = vsel %vm1098_vm3, %v2039_v56, 0.0 }
 0x2d2   : > { %v1214_v3 = vpop.xlane.xlu2 %1213  ;;  %1234 = vadd.xlane.f32.xlu0 %v1233_v2 }
 0x2d3   : > { %v1218_v38 = vsub.f32 %v1201_v54, %v1214_v3 }
 0x2d5   : > { %v2041_v4 = vpop.eup %2040  ;;  %v1225_v6 = vmul.f32 1.442695, %v1218_v38 }
 0x2d6   : > { %1953 = vmatmul.msk.f32.vlgmr.msrb.gmra.mxu3 %vm1098_vm3, %v2041_v4  ;;  %v1230_v35 = vsel %vm1098_vm3, %v2041_v4, 0.0 }
 0x2d7   : > { %2042 = vpow2.f32 %v1225_v6 }
 0x2da   : > { %1231 = vadd.xlane.f32.xlu0 %v1230_v35 }
 0x2dd   : > { %v2043_v7 = vpop.eup %2042 }
 0x2de   : > { %1955 = vmatmul.msk.f32.vlgmr.msrb.gmra.mxu1 %vm1098_vm3, %v2043_v7  ;;  %v1236_v9 = vsel %vm1098_vm3, %v2043_v7, 0.0 }
 0x2df   : > { %1237 = vadd.xlane.f32.xlu2 %v1236_v9 }
 0x344   : > { %v1229_v47 = vpop.xlane.xlu1 %1228 }
 0x345   : > { %2044 = vrcp.f32 %v1229_v47  ;;  %v1235_v48 = vpop.xlane.xlu0 %1234  ;;  %v1250_v19 = vand.u32 2147483648, %v1229_v47  ;;  %v1248_v24 = vand.u32 2147483647, %v1229_v47  ;;  %vm1244_vm6 = vweird.f32 %v1229_v47 }
 0x346   : > { %2046 = vrcp.f32 %v1235_v48  ;;  %v1278_v21 = vand.u32 2147483648, %v1235_v48  ;;  %v1276_v28 = vand.u32 2147483647, %v1235_v48  ;;  %vm1272_vm7 = vweird.f32 %v1235_v48 }
 0x347   : > { %v1251_v27 = vor.u32 1.1754944e-38, %v1250_v19  ;;  %vm1249_vm10 = vcmp.eq.f32.partialorder %v1248_v24, 8.507059e+37 }
 0x348   : > { %v1279_v33 = vor.u32 1.1754944e-38, %v1278_v21  ;;  %vm1277_vm11 = vcmp.eq.f32.partialorder %v1276_v28, 8.507059e+37 }
 0x34b   : > { %v2045_v8 = vpop.eup %2044 }
 0x34c   : > { %v2047_v10 = vpop.eup %2046  ;;  %v1240_v11 = vmul.f32 %v2045_v8, %v1229_v47  ;;  %vm1245_vm4 = vweird.f32 %v2045_v8 }
 0x34d   : > { %v1268_v12 = vmul.f32 %v2047_v10, %v1235_v48  ;;  %v1232_v13 = vpop.xlane.xlu0 %1231  ;;  %vm1273_vm5 = vweird.f32 %v2047_v10  ;;  %vm1246_vm8 = vmor %vm1244_vm6, %vm1245_vm4 }
 0x34e   : > { %v1241_v15 = vsub.f32 1.0, %v1240_v11  ;;  %2048 = vrcp.f32 %v1232_v13  ;;  %vm1274_vm9 = vmor %vm1272_vm7, %vm1273_vm5  ;;  %v1262_v43 = vand.u32 2147483647, %v1232_v13  ;;  %v1264_v37 = vand.u32 2147483648, %v1232_v13  ;;  %v1361_v45 = vpop.f32.mrf.mxu1 }
 0x34f   : > { %v1269_v16 = vsub.f32 1.0, %v1268_v12  ;;  %vm1258_vm13 = vweird.f32 %v1232_v13  ;;  %vm1514_vm7 = vcmask 130048  }
 0x350   : > { %v1242_v17 = vmul.f32 %v2045_v8, %v1241_v15  ;;  %vm1263_vm15 = vcmp.eq.f32.partialorder %v1262_v43, 8.507059e+37  ;;  %v1265_v53 = vor.u32 1.1754944e-38, %v1264_v37 }
 0x351   : > { %v1270_v20 = vmul.f32 %v2047_v10, %v1269_v16 }
 0x352   : > { %v1243_v29 = vadd.f32 %v2045_v8, %v1242_v17  ;;  %v1238_v30 = vpop.xlane.xlu2 %1237 }
 0x353   : > { %v1271_v14 = vadd.f32 %v2047_v10, %v1270_v20  ;;  %2050 = vrcp.f32 %v1238_v30  ;;  %v1315_v42 = vpop.f32.mrf.mxu2  ;;  %v1290_v23 = vand.u32 2147483647, %v1238_v30  ;;  %v1292_v60 = vand.u32 2147483648, %v1238_v30 }
 0x354   : > { %v2049_v31 = vpop.eup %2048  ;;  %v1247_v32 = vsel %vm1246_vm8, %v2045_v8, %v1243_v29  ;;  %vm1286_vm4 = vweird.f32 %v1238_v30  ;;  %vm1516_vm8 = vcmask 195584  }
 0x355   : > { %v1254_v18 = vmul.f32 %v2049_v31, %v1232_v13  ;;  %v1275_v22 = vsel %vm1274_vm9, %v2047_v10, %v1271_v14  ;;  %v1252_v34 = vsel %vm1249_vm10, %v1251_v27, %v1247_v32  ;;  %vm1259_vm12 = vweird.f32 %v2049_v31 }
 0x356   : > { %v1280_v41 = vsel %vm1277_vm11, %v1279_v33, %v1275_v22  ;;  %v1387_v46 = vmul.f32 %v1315_v42, %v1252_v34  ;;  %vm1260_vm14 = vmor %vm1258_vm13, %vm1259_vm12  ;;  %v1293_v55 = vor.u32 1.1754944e-38, %v1292_v60  ;;  %vm1291_vm6 = vcmp.eq.f32.partialorder %v1290_v23, 8.507059e+37 }
 0x357   : > { %v1255_v40 = vsub.f32 1.0, %v1254_v18  ;;  %v1389_v50 = vmul.f32 %v1361_v45, %v1280_v41 }
 0x358   : > { %v1393_v54 = vrot.slane %v1387_v46, 4 }
 0x359   : > { %v2051_v44 = vpop.eup %2050  ;;  %v1256_v49 = vmul.f32 %v2049_v31, %v1255_v40  ;;  %v1391_v57 = vrot.slane %v1389_v50, 4  ;;  %v1338_v62 = vpop.f32.mrf.mxu3 }
 0x35a   : > { %v1282_v25 = vmul.f32 %v2051_v44, %v1238_v30  ;;  %vm1287_vm0 = vweird.f32 %v2051_v44  ;;  %v1394_v63 = vsel %vm733_vm2, %v1389_v50, %v1393_v54 }
 0x35b   : > { %v1257_v51 = vadd.f32 %v2049_v31, %v1256_v49  ;;  %vm1288_vm5 = vmor %vm1286_vm4, %vm1287_vm0  ;;  %v1392_v56 = vsel %vm733_vm2, %v1391_v57, %v1387_v46  ;;  %v1402_v2 = vperm.slane %v1394_v63, %v2298_v26  ;;  %v1384_v38 = vpop.f32.mrf.mxu1 }
 0x35c   : > { %v1283_v52 = vsub.f32 1.0, %v1282_v25  ;;  %v1398_v35 = vperm.slane %v1392_v56, %v2298_v26 }
 0x35d   : > { %v1261_v58 = vsel %vm1260_vm14, %v2049_v31, %v1257_v51  ;;  %v1429_v47 = vrot.slane %v1402_v2, 4 }
 0x35e   : > { %v1266_v61 = vsel %vm1263_vm15, %v1265_v53, %v1261_v58  ;;  %v1284_v59 = vmul.f32 %v2051_v44, %v1283_v52  ;;  %v1417_v10 = vrot.slane %v1398_v35, 4  ;;  %vm1676_vm15 = vcmask 523264  }
 0x35f   : > { %v1388_v0 = vmul.f32 %v1338_v62, %v1266_v61 }
 0x360   : > { %v1285_v36 = vadd.f32 %v2051_v44, %v1284_v59 }
 0x361   : > { %v1405_v4 = vrot.slane %v1388_v0, 4 }
 0x362   : > { %v1289_v1 = vsel %vm1288_vm5, %v2051_v44, %v1285_v36 }
 0x363   : > { %v1294_v3 = vsel %vm1291_vm6, %v1293_v55, %v1289_v1  ;;  %v1521_v1 = vld [vmem:[%s2659_s30 + $0x18] sm:$0xff] }
 0x364   : > { %v1390_v6 = vmul.f32 %v1384_v38, %v1294_v3  ;;  %1541 = vmatpush.msra.mxu2 %v1521_v1  ;;  %v1518_v3 = vld [vmem:[%s2659_s30] sm:$0xff] }
 0x366   : > { %v1403_v7 = vrot.slane %v1390_v6, 4  ;;  %v1406_v9 = vsel %vm733_vm2, %v1390_v6, %v1405_v4 }
 0x367   : > { %v1414_v48 = vperm.slane %v1406_v9, %v2298_v26 }
 0x368   : > { %v1404_v8 = vsel %vm733_vm2, %v1403_v7, %v1388_v0 }
 0x369   : > { %v1410_v11 = vperm.slane %v1404_v8, %v2298_v26  ;;  %v1427_v12 = vrot.slane %v1414_v48, 4  ;;  %v1430_v13 = vsel %vm733_vm2, %v1414_v48, %v1429_v47  ;;  %v2029_v47 = vld [vmem:[%s2660_s19] ss:$0 sm:$0xff] }
 0x36a   : > { %v1438_v15 = vperm.slane %v1430_v13, %v2313_v39 }
 0x36b   : > { %v1415_v16 = vrot.slane %v1410_v11, 4  ;;  %v1418_v17 = vsel %vm733_vm2, %v1410_v11, %v1417_v10  ;;  %v1428_v19 = vsel %vm733_vm2, %v1427_v12, %v1402_v2  ;;  %v1519_v2 = vld [vmem:[%s2659_s30 + $0x8] sm:$0xff]  ;;  %v2110_v12 = vmov 32.0  }
 0x36c   : > { %v1426_v20 = vperm.slane %v1418_v17, %v2313_v39  ;;  %v1434_v21 = vperm.slane %v1428_v19, %v2313_v39  ;;  %v1445_v24 = vrot.slane %v1438_v15, 4  ;;  %2052 = vrcp.f32 %v2110_v12 }
 0x36d   : > { %v1416_v28 = vsel %vm733_vm2, %v1415_v16, %v1398_v35 }
 0x36e   : > { %v1422_v29 = vperm.slane %v1416_v28, %v2313_v39  ;;  %v1441_v30 = vrot.slane %v1426_v20, 4  ;;  %v1443_v14 = vrot.slane %v1434_v21, 4  ;;  %v1446_v31 = vsel %vm733_vm2, 0.0, %v1445_v24 }
 0x36f   : > { %v1458_v32 = vsel %vm733_vm2, %v1445_v24, %v1434_v21  ;;  %v1463_v27 = vrot.slane %v1446_v31, 4  ;;  %v1590_v31 = vld [vmem:[%s2252_s0 + $0x8] sm:$0xff] }
 0x370   : > { %v1442_v18 = vsel %vm733_vm2, 0.0, %v1441_v30  ;;  %v1439_v22 = vrot.slane %v1422_v29, 4  ;;  %v1444_v33 = vsel %vm733_vm2, 0.0, %v1443_v14  ;;  %v1447_v34 = vsel %vm733_vm2, %v1441_v30, %v1422_v29  ;;  %v1592_v30 = vld [vmem:[%s2252_s0 + $0x18] sm:$0xff]  ;;  %v1591_v14 = vld [vmem:[%s2252_s0 + $0x10] sm:$0xff] }
 0x371   : > { %v1452_v40 = vrot.slane %v1442_v18, 4  ;;  %v1451_v41 = vperm.slane %v1447_v34, %v2298_v26  ;;  %v1462_v42 = vperm.slane %v1458_v32, %v2298_v26  ;;  %v1464_v43 = vsel %vm733_vm2, %v1463_v27, %v1444_v33  ;;  %1612 = vmatpush.msra.mxu3 %v1592_v30  ;;  %v1589_v32 = vld [vmem:[%s2252_s0] sm:$0xff] }
 0x372   : > { %v1440_v37 = vsel %vm733_vm2, 0.0, %v1439_v22  ;;  %v1468_v44 = vperm.slane %v1464_v43, %v2298_v26  ;;  %v2053_v13 = vpop.eup %2052 }
 0x373   : > { %v1453_v45 = vsel %vm733_vm2, %v1452_v40, %v1440_v37  ;;  %v1471_v46 = vrot.slane %v1451_v41, 4  ;;  %v1483_v49 = vrot.slane %v1462_v42, 4  ;;  %v1556_v15 = vmul.f32 32.0, %v2053_v13  ;;  %1613 = vmatpush.msra.mxu3 %v1591_v14  ;;  %v2030_v37 = vld [vmem:[%s667_s25] ss:$0 sm:$0xff]  ;;  %s2663_s25 = sld [smem:[#allocation16_spill]] }
 0x374   : > { %v1457_v50 = vperm.slane %v1453_v45, %v2298_v26  ;;  %v1481_v25 = vrot.slane %v1468_v44, 4 }
 0x375   : > { %v1484_v51 = vsel %vm733_vm2, %v1468_v44, %v1483_v49  ;;  %v1557_v16 = vsub.f32 1.0, %v1556_v15  ;;  %1614 = vmatpush.msra.mxu3 %v1590_v31 }
 0x376   : > { %v1472_v52 = vsel %vm733_vm2, %v1457_v50, %v1471_v46  ;;  %v1492_v53 = vperm.slane %v1484_v51, %v2313_v39  ;;  %v1469_v54 = vrot.slane %v1457_v50, 4  ;;  %v1482_v58 = vsel %vm733_vm2, %v1481_v25, %v1462_v42  ;;  %v2031_v46 = vld [vmem:[%s670_s24] ss:$0 sm:$0xff] }
 0x377   : > { %v1480_v23 = vperm.slane %v1472_v52, %v2313_v39  ;;  %v1488_v60 = vperm.slane %v1482_v58, %v2313_v39  ;;  %v1558_v17 = vmul.f32 %v2053_v13, %v1557_v16  ;;  %1615 = vmatpush.msra.mxu3 %v1589_v32  ;;  %v2032_v25 = vld [vmem:[%s2662_s8] ss:$0 sm:$0xff] }
 0x378   : > { %v1497_v57 = vrot.slane %v1492_v53, 4  ;;  %v1470_v61 = vsel %vm733_vm2, %v1469_v54, %v1451_v41 }
 0x379   : > { %v1499_v26 = vrot.slane %v1480_v23, 4  ;;  %v1476_v59 = vperm.slane %v1470_v61, %v2313_v39  ;;  %v1493_v62 = vrot.slane %v1488_v60, 4  ;;  %v1520_v39 = vld [vmem:[%s2659_s30 + $0x10] sm:$0xff]  ;;  %v1559_v19 = vadd.f32 %v2053_v13, %v1558_v17  ;;  %s2664_s9 = scalar_lea.vmem %s2663_s25, %s2222_s20 }
 0x37a   : > { %v1498_v63 = vsel %vm733_vm2, %v1497_v57, %v1480_v23  ;;  %1542 = vmatpush.msra.mxu2 %v1520_v39  ;;  %v1668_v39 = vld [vmem:[%s2266_s12 + $0x20] sm:$0xff] }
 0x37b   : > { %1506 = vrot.lane.b32.xlu2 %v1498_v63, %s2107_s22  ;;  %v1500_v0 = vsel %vm733_vm2, %v1492_v53, %v1499_v26  ;;  %v1495_v36 = vrot.slane %v1476_v59, 4  ;;  %v1494_v55 = vsel %vm733_vm2, %v1493_v62, %v1476_v59  ;;  %v1671_v62 = vld [vmem:[%s2266_s12 + $0x38] sm:$0xff] }
 0x37c   : > { %1510 = vrot.lane.b32.xlu0 %v1500_v0, %s2108_s23  ;;  %1543 = vmatpush.msra.mxu2 %v1519_v2  ;;  %v1670_v0 = vld [vmem:[%s2266_s12 + $0x30] sm:$0xff] }
 0x37d   : > { %v1496_v56 = vsel %vm733_vm2, %v1488_v60, %v1495_v36  ;;  %vm1560_vm2 = vweird.f32 %v2053_v13  ;;  %1688 = vmatpush.msrb.mxu0 %v1671_v62 }
 0x37e   : > { %1502 = vrot.lane.b32.xlu1 %v1496_v56, %s2109_s28  ;;  %1544 = vmatpush.msra.mxu2 %v1518_v3  ;;  %v2535_v20 = vsel %vm1560_vm2, %v2053_v13, %v1559_v19  ;;  %v1669_v56 = vld [vmem:[%s2266_s12 + $0x28] sm:$0xff]  ;;  %v1667_v3 = vld [vmem:[%s2266_s12 + $0x18] sm:$0xff] }
 0x37f   : > { %1689 = vmatpush.msrb.mxu0 %v1670_v0 }
 0x381   : > { %1690 = vmatpush.msrb.mxu0 %v1669_v56 }
 0x383   : > { %1691 = vmatpush.msrb.mxu0 %v1668_v39 }
 0x385   : > { %1692 = vmatpush.msrb.mxu0 %v1667_v3 }
 0x3d5   : > { %v1507_v4 = vpop.permute.xlu2 %1506 }
 0x3ee   : > { %v1511_v35 = vpop.permute.xlu0 %1510 }
 0x3f0   : > { %v1503_v38 = vpop.permute.xlu1 %1502 }
 0x3f1   : > { %v1513_v6 = vsel %vm1098_vm3, %v1494_v55, %v1503_v38 }
 0x3f2   : > { %v1515_v7 = vsel %vm1514_vm7, %v1513_v6, %v1507_v4  ;;  %v1666_v4 = vld [vmem:[%s2266_s12 + $0x10] sm:$0xff] }
 0x3f3   : > { %v1517_v9 = vsel %vm1516_vm8, %v1515_v7, %v1511_v35  ;;  %v1665_v35 = vld [vmem:[%s2266_s12 + $0x8] sm:$0xff]  ;;  %1693 = vmatpush.msrb.mxu0 %v1666_v4 }
 0x3f4   : > { %1956 = vmatmul.msk.f32.vlgmr.msra.gmra.mxu2 %vm697_vm1, %v1517_v9 }
 0x3f5   : > { %1694 = vmatpush.msrb.mxu0 %v1665_v35 }
 0x477   : > { %v1546_v48 = vpop.f32.mrf.mxu2 }
 0x478   : > { %v1547_v8 = vadd.f32 %v2029_v47, %v1546_v48  ;;  %v1664_v47 = vld [vmem:[%s2266_s12] sm:$0xff] }
 0x479   : > { %1695 = vmatpush.msrb.mxu0 %v1664_v47 }
 0x47a   : > { %v1549_v10 = vadd.f32 %v1547_v8, %v2292_v5 }
 0x47c   : > { %v1552_v11 = vsel %vm697_vm1, %v1549_v10, 0.0 }
 0x47d   : > { %1553 = vadd.xlane.f32.xlu1 %v1552_v11 }
 0x4f0   : > { %v1554_v21 = vpop.xlane.xlu1 %1553 }
 0x4f1   : > { %v1562_v5 = vmul.f32 %v2535_v20, %v1554_v21 }
 0x4f3   : > { %v1563_v24 = vsub.f32 %v1549_v10, %v1562_v5 }
 0x4f5   : > { %v1564_v28 = vmul.f32 %v1563_v24, %v1563_v24 }
 0x4f7   : > { %v1565_v29 = vsel %vm697_vm1, %v1564_v28, 0.0 }
 0x4f8   : > { %1566 = vadd.xlane.f32.xlu0 %v1565_v29 }
 0x56b   : > { %v1567_v27 = vpop.xlane.xlu0 %1566 }
 0x56c   : > { %v1568_v18 = vmul.f32 %v1567_v27, %v2535_v20 }
 0x56e   : > { %v1569_v22 = vadd.f32 1e-05, %v1568_v18 }
 0x570   : > { %2054 = vrsqrt.f32 %v1569_v22  ;;  %vm1576_vm9 = vweird.f32 %v1569_v22 }
 0x576   : > { %v2055_v33 = vpop.eup %2054 }
 0x577   : > { %v1571_v34 = vmul.f32 %v2055_v33, %v1569_v22  ;;  %vm1577_vm3 = vweird.f32 %v2055_v33  ;;  %v2033_v22 = vld [vmem:[%s2664_s9] ss:$0 sm:$0xff] }
 0x578   : > { %vm1578_vm10 = vmor %vm1576_vm9, %vm1577_vm3 }
 0x579   : > { %v1572_v40 = vmul.f32 %v2055_v33, %v1571_v34 }
 0x57b   : > { %v1573_v41 = vmul.f32 0.5, %v1572_v40 }
 0x57d   : > { %v1574_v42 = vsub.f32 1.5, %v1573_v41 }
 0x57f   : > { %v1575_v43 = vmul.f32 %v2055_v33, %v1574_v42 }
 0x581   : > { %v1579_v44 = vsel %vm1578_vm10, %v2055_v33, %v1575_v43 }
 0x582   : > { %v1580_v45 = vmul.f32 %v1579_v44, %v1563_v24 }
 0x584   : > { %v1584_v49 = vmul.f32 %v2030_v37, %v1580_v45 }
 0x586   : > { %v2554_v50 = vadd.f32 %v2031_v46, %v1584_v49 }
 0x588   : > { %1957 = vmatmul.msk.f32.vlgmr.msra.gmra.mxu3 %vm697_vm1, %v2554_v50 }
 0x60b   : > { %v1617_v51 = vpop.f32.mrf.mxu3 }
 0x60c   : > { %v1618_v52 = vadd.f32 %v2032_v25, %v1617_v51 }
 0x60e   : > { %v1621_v53 = vmul.f32 0.70710677, %v1618_v52  ;;  %v1620_v32 = vmul.f32 0.5, %v1618_v52 }
 0x610   : > { %v1622_v54 = vmul.f32 %v1621_v53, %v1621_v53 }
 0x612   : > { %v1623_v58 = vmin.f32 %v1622_v54, 16.0 }
 0x614   : > { %v1624_v23 = vmul.f32 2.1237322e-06, %v1623_v58  ;;  %v1635_v60 = vmul.f32 3.8918573e-05, %v1623_v58 }
 0x616   : > { %v1625_v57 = vadd.f32 0.00028619796, %v1624_v23  ;;  %v1636_v61 = vadd.f32 0.001143296, %v1635_v60  ;;  %v2034_v23 = vld [vmem:[%s673_s6] ss:$0 sm:$0xff] }
 0x618   : > { %v1626_v26 = vmul.f32 %v1625_v57, %v1623_v58  ;;  %v1637_v59 = vmul.f32 %v1636_v61, %v1623_v58 }
 0x61a   : > { %v1638_v63 = vadd.f32 0.014752088, %v1637_v59  ;;  %v1627_v36 = vadd.f32 0.0036580483, %v1626_v26 }
 0x61c   : > { %v1639_v55 = vmul.f32 %v1638_v63, %v1623_v58  ;;  %v1628_v2 = vmul.f32 %v1627_v36, %v1623_v58 }
 0x61e   : > { %v1640_v1 = vadd.f32 0.112945676, %v1639_v55  ;;  %v1629_v7 = vadd.f32 0.05243302, %v1628_v2 }
 0x620   : > { %v1641_v38 = vmul.f32 %v1640_v1, %v1623_v58  ;;  %v1630_v8 = vmul.f32 %v1629_v7, %v1623_v58 }
 0x622   : > { %v1642_v6 = vadd.f32 0.4994258, %v1641_v38  ;;  %v1631_v10 = vadd.f32 0.18741608, %v1630_v8 }
 0x624   : > { %v1643_v9 = vmul.f32 %v1642_v6, %v1623_v58  ;;  %v1632_v12 = vmul.f32 %v1631_v10, %v1623_v58 }
 0x626   : > { %v1644_v48 = vadd.f32 1.0, %v1643_v9  ;;  %v1633_v17 = vadd.f32 1.1283791, %v1632_v12 }
 0x628   : > { %2056 = vrcp.f32 %v1644_v48  ;;  %v1656_v16 = vand.u32 2147483648, %v1644_v48  ;;  %v1654_v21 = vand.u32 2147483647, %v1644_v48  ;;  %vm1650_vm12 = vweird.f32 %v1644_v48 }
 0x629   : > { %v1634_v28 = vmul.f32 %v1633_v17, %v1621_v53 }
 0x62a   : > { %v1657_v24 = vor.u32 1.1754944e-38, %v1656_v16  ;;  %vm1655_vm14 = vcmp.eq.f32.partialorder %v1654_v21, 8.507059e+37 }
 0x62e   : > { %v2057_v11 = vpop.eup %2056 }
 0x62f   : > { %v1646_v13 = vmul.f32 %v2057_v11, %v1644_v48  ;;  %vm1651_vm11 = vweird.f32 %v2057_v11 }
 0x630   : > { %vm1652_vm13 = vmor %vm1650_vm12, %vm1651_vm11 }
 0x631   : > { %v1647_v15 = vsub.f32 1.0, %v1646_v13 }
 0x633   : > { %v1648_v19 = vmul.f32 %v2057_v11, %v1647_v15 }
 0x635   : > { %v1649_v5 = vadd.f32 %v2057_v11, %v1648_v19 }
 0x637   : > { %v1653_v29 = vsel %vm1652_vm13, %v2057_v11, %v1649_v5 }
 0x638   : > { %v1658_v30 = vsel %vm1655_vm14, %v1657_v24, %v1653_v29 }
 0x639   : > { %v1659_v14 = vmul.f32 %v1658_v30, %v1634_v28 }
 0x63b   : > { %v1958_v31 = vclamps-f32 %v1659_v14, 1.0 }
 0x63d   : > { %v1662_v27 = vadd.f32 1.0, %v1958_v31 }
 0x63f   : > { %v1663_v18 = vmul.f32 %v1662_v27, %v1620_v32 }
 0x641   : > { %1959 = vmatmul.msk.f32.vlgmr.msrb.gmra.mxu0 %vm1676_vm15, %v1663_v18 }
 0x6be   : > { %v1697_v33 = vpop.f32.mrf.mxu0 }
 0x6bf   : > { %v1698_v34 = vadd.f32 %v2033_v22, %v1697_v33 }
 0x6c1   : > { %v1700_v40 = vadd.f32 %v1698_v34, %v2554_v50 }
 0x6c3   : > { %v1703_v41 = vsel %vm697_vm1, %v1700_v40, 0.0 }
 0x6c4   : > { %1704 = vadd.xlane.f32.xlu2 %v1703_v41 }
 0x737   : > { %v1705_v42 = vpop.xlane.xlu2 %1704 }
 0x738   : > { %v1706_v43 = vmul.f32 %v1705_v42, %v2535_v20 }
 0x73a   : > { %v1707_v37 = vsub.f32 %v1700_v40, %v1706_v43 }
 0x73c   : > { %v1708_v44 = vmul.f32 %v1707_v37, %v1707_v37 }
 0x73e   : > { %v1709_v45 = vsel %vm697_vm1, %v1708_v44, 0.0 }
 0x73f   : > { %1710 = vadd.xlane.f32.xlu1 %v1709_v45 }
 0x7b2   : > { %v1711_v46 = vpop.xlane.xlu1 %1710 }
 0x7b3   : > { %v1712_v49 = vmul.f32 %v1711_v46, %v2535_v20  ;;  %v2035_v20 = vld [vmem:[%s676_s13] ss:$0 sm:$0xff] }
 0x7b5   : > { %v1713_v25 = vadd.f32 1e-05, %v1712_v49 }
 0x7b7   : > { %2058 = vrsqrt.f32 %v1713_v25  ;;  %vm1720_vm4 = vweird.f32 %v1713_v25 }
 0x7bd   : > { %v2059_v50 = vpop.eup %2058 }
 0x7be   : > { %v1715_v51 = vmul.f32 %v2059_v50, %v1713_v25  ;;  %vm1721_vm0 = vweird.f32 %v2059_v50 }
 0x7bf   : > { %vm1722_vm5 = vmor %vm1720_vm4, %vm1721_vm0 }
 0x7c0   : > { %v1716_v52 = vmul.f32 %v2059_v50, %v1715_v51 }
 0x7c2   : > { %v1717_v53 = vmul.f32 0.5, %v1716_v52 }
 0x7c4   : > { %v1718_v54 = vsub.f32 1.5, %v1717_v53 }
 0x7c6   : > { %v1719_v58 = vmul.f32 %v2059_v50, %v1718_v54 }
 0x7c8   : > { %v1723_v60 = vsel %vm1722_vm5, %v2059_v50, %v1719_v58 }
 0x7c9   : > { %v1724_v57 = vmul.f32 %v1723_v60, %v1707_v37 }
 0x7cb   : > { %v1728_v61 = vmul.f32 %v2034_v23, %v1724_v57 }
 0x7cd   : > { %v1732_v26 = vadd.f32 %v2035_v20, %v1728_v61 }
 0x7cf   : > { %1733 = vst.msk [vmem:[%s2287_s14] sm:$0xff] %vm697_vm1, %v1732_v26 }
 0x7d0 PF: > { %s2667_s23 = sld [smem:[#allocation5_spill]] }
 0x7d1   : > { %s2668_s29 = sld [smem:[#allocation3_spill]] }
 0x7d2   : > { %s2669_s30 = sld [smem:[#allocation4_spill]] }
 0x7d3   : > { %s2670_s15 = sld [smem:[#allocation6_spill]] }
 0x7d4   : > { %s2671_s16 = sld [smem:[#allocation7_spill]] }
 0x7d6   : > { %s24_s17 = sadd.s32 1, %s2667_s23  }
 0x7d7   : > { %p21_p8 = scmp.ge.s32.totalorder %s24_s17, 6  }
 0x7d9   :  { %23 = sbr.rel (!%p21_p8) target bundleno = 12 (0xc), region = 149 }

</bundles_post_ra>
